<compile_context>
chip_gen: v6e
topology: v6e:2x2x1
jax: 0.10.0
libtpu: 0.0.40
codegen_flags: <defaults>
</compile_context>

<pallas_src>
import functools

import jax
import jax.numpy as jnp
from jax.experimental import pallas as pl
from jax.experimental.pallas import tpu as pltpu

HIDDEN = 512


def _round_up(n, m):
    return ((n + m - 1) // m) * m


def _dqn_kernel(x_ref,
                w1_ref, b1_ref,            # fused layer 1 (value | advantage)
                wv2_ref, bv2_ref,          # value layer 2
                wa2_ref, ba2_ref,          # advantage layer 2
                w3v_ref, w3a_ref, b3_ref,  # fused layer 3 (dueling combine folded in)
                out_ref):
    # Activations are cast to bf16 only as MXU operands; accumulation is f32.
    x = x_ref[...].astype(jnp.bfloat16)                                   # (TB, obs)

    # ---- fused layer 1: one (TB, obs) @ (obs, 1024) matmul ----
    h1 = jnp.dot(x, w1_ref[...], preferred_element_type=jnp.float32) + b1_ref[...]
    h1 = jnp.maximum(h1, 0.0).astype(jnp.bfloat16)                        # (TB, 1024)

    # ---- layer 2: one matmul per stream (different inputs) ----
    hv = jnp.dot(h1[:, :HIDDEN], wv2_ref[...],
                 preferred_element_type=jnp.float32) + bv2_ref[...]
    hv = jnp.maximum(hv, 0.0).astype(jnp.bfloat16)                        # (TB, 512)
    ha = jnp.dot(h1[:, HIDDEN:], wa2_ref[...],
                 preferred_element_type=jnp.float32) + ba2_ref[...]
    ha = jnp.maximum(ha, 0.0).astype(jnp.bfloat16)                        # (TB, 512)

    # ---- fused layer 3 + dueling combine ----
    # out = hv @ broadcast(wv3) + ha @ (wa3 - mean(wa3)) + (bv3 + ba3 - mean(ba3))
    #     = val + adv - adv.mean(dim=1, keepdim=True)
    out_ref[...] = (jnp.dot(hv, w3v_ref[...], preferred_element_type=jnp.float32)
                    + jnp.dot(ha, w3a_ref[...], preferred_element_type=jnp.float32)
                    + b3_ref[...])


@functools.partial(jax.jit, static_argnames=("block_b",))
def simple_ff_dqn_forward(x, fused, *, block_b=128):
    """x: (B, obs_len) f32.  fused: dict from fuse_params()."""
    B, obs_len = x.shape
    A = fused["w3a"].shape[1]

    # Batch tile: multiple of 8 sublanes, capped at block_b; pad batch to fit.
    TB = min(block_b, _round_up(B, 8))
    Bp = _round_up(B, TB)
    if Bp != B:
        x = jnp.pad(x, ((0, Bp - B), (0, 0)))
    grid = (Bp // TB,)

    const = lambda i: (0, 0)  # weights: same block every step -> VMEM-resident
    in_specs = [
        pl.BlockSpec((TB, obs_len), lambda i: (i, 0)),   # x
        pl.BlockSpec((obs_len, 2 * HIDDEN), const),      # w1   (bf16)
        pl.BlockSpec((1, 2 * HIDDEN), const),            # b1   (f32)
        pl.BlockSpec((HIDDEN, HIDDEN), const),           # wv2  (bf16)
        pl.BlockSpec((1, HIDDEN), const),                # bv2  (f32)
        pl.BlockSpec((HIDDEN, HIDDEN), const),           # wa2  (bf16)
        pl.BlockSpec((1, HIDDEN), const),                # ba2  (f32)
        pl.BlockSpec((HIDDEN, A), const),                # w3v  (bf16)
        pl.BlockSpec((HIDDEN, A), const),                # w3a  (bf16)
        pl.BlockSpec((1, A), const),                     # b3   (f32)
    ]
    out_spec = pl.BlockSpec((TB, A), lambda i: (i, 0))

    out = pl.pallas_call(
        _dqn_kernel,
        out_shape=jax.ShapeDtypeStruct((Bp, A), jnp.float32),
        grid_spec=pltpu.PrefetchScalarGridSpec(
            num_scalar_prefetch=0,
            grid=grid,
            in_specs=in_specs,
            out_specs=out_spec,
        ),
        compiler_params=pltpu.CompilerParams(
            dimension_semantics=("parallel",),        # megacore: split batch tiles
            vmem_limit_bytes=32 * 1024 * 1024,        # explicit (v5e default is 16 MiB)
        ),
    )(x, fused["w1"], fused["b1"], fused["wv2"], fused["bv2"],
      fused["wa2"], fused["ba2"], fused["w3v"], fused["w3a"], fused["b3"])
    return out[:B]


def init_params(key, obs_len, actions_n):
    """Init mimicking PyTorch Linear default U(-1/sqrt(fan_in), +1/sqrt(fan_in)).

    Weights are stored transposed: (in_features, out_features)."""
    def linear(key, fan_in, fan_out):
        kw, kb = jax.random.split(key)
        bound = 1.0 / jnp.sqrt(fan_in)
        w = jax.random.uniform(kw, (fan_in, fan_out), jnp.float32, -bound, bound)
        b = jax.random.uniform(kb, (1, fan_out), jnp.float32, -bound, bound)
        return w, b

    keys = jax.random.split(key, 6)
    wv1, bv1 = linear(keys[0], obs_len, HIDDEN)
    wv2, bv2 = linear(keys[1], HIDDEN, HIDDEN)
    wv3, bv3 = linear(keys[2], HIDDEN, 1)
    wa1, ba1 = linear(keys[3], obs_len, HIDDEN)
    wa2, ba2 = linear(keys[4], HIDDEN, HIDDEN)
    wa3, ba3 = linear(keys[5], HIDDEN, actions_n)
    return dict(wv1=wv1, bv1=bv1, wv2=wv2, bv2=bv2, wv3=wv3, bv3=bv3,
                wa1=wa1, ba1=ba1, wa2=wa2, ba2=ba2, wa3=wa3, ba3=ba3)


def fuse_params(p):
    """Pre-fuse / pre-fold weights for the kernel (done once, off the hot path)."""
    A = p["wa3"].shape[1]
    # Layer 1: [value | advantage] side by side -> (obs_len, 1024).
    w1 = jnp.concatenate([p["wv1"], p["wa1"]], axis=1).astype(jnp.bfloat16)
    b1 = jnp.concatenate([p["bv1"], p["ba1"]], axis=1)                    # f32
    # Layer 3: fold dueling mean into advantage weights (exact by linearity)
    # and broadcast the single value column into every action column, so
    # hv @ w3v + ha @ w3a + b3 == val + adv - adv.mean(axis=1, keepdims=True).
    wa3c = p["wa3"] - jnp.mean(p["wa3"], axis=1, keepdims=True)
    b3 = p["bv3"] + p["ba3"] - jnp.mean(p["ba3"], axis=1, keepdims=True)  # (1, A) f32
    w3v = jnp.broadcast_to(p["wv3"], (HIDDEN, A)).astype(jnp.bfloat16)    # (512, A)
    w3a = wa3c.astype(jnp.bfloat16)                                       # (512, A)
    return dict(
        w1=w1, b1=b1,
        wv2=p["wv2"].astype(jnp.bfloat16), bv2=p["bv2"],
        wa2=p["wa2"].astype(jnp.bfloat16), ba2=p["ba2"],
        w3v=w3v, w3a=w3a, b3=b3,
    )


def reference_forward(x, p):
    """Pure-JAX f32 reference matching the PyTorch module exactly."""
    def mlp(x, w1, b1, w2, b2, w3, b3):
        h = jnp.maximum(x @ w1 + b1, 0.0)
        h = jnp.maximum(h @ w2 + b2, 0.0)
        return h @ w3 + b3
    val = mlp(x, p["wv1"], p["bv1"], p["wv2"], p["bv2"], p["wv3"], p["bv3"])
    adv = mlp(x, p["wa1"], p["ba1"], p["wa2"], p["ba2"], p["wa3"], p["ba3"])
    return val + adv - jnp.mean(adv, axis=1, keepdims=True)


if __name__ == "__main__":
    key = jax.random.PRNGKey(0)
    k_x, k_p = jax.random.split(key)

    obs_len = 32
    actions_n = 4

    params = init_params(k_p, obs_len, actions_n)
    fused = fuse_params(params)

    # Small batch (single grid step) and a larger batch (multi-step grid,
    # weights resident across steps) — both checked against the f32 reference.
    for batch in (8, 256):
        kx = jax.random.fold_in(k_x, batch)
        x = jax.random.normal(kx, (batch, obs_len), jnp.float32)

        out = jax.block_until_ready(simple_ff_dqn_forward(x, fused))
        ref = reference_forward(x, params)

        assert out.shape == (batch, actions_n), out.shape
        # bf16 weight / activation operands -> relaxed tolerance vs f32 reference
        err = float(jnp.max(jnp.abs(out - ref)))
        assert jnp.allclose(out, ref, atol=2e-2, rtol=2e-2), ("max abs err", err)

    print("KERNEL_OK")
</pallas_src>

<mosaic_0001>
module attributes {stable_mosaic.version = 11 : i64} {
  func.func @_dqn_kernel(%arg0: i32, %arg1: memref<8x32xf32, #tpu.memory_space<vmem>>, %arg2: memref<32x1024xbf16, #tpu.memory_space<vmem>>, %arg3: memref<1x1024xf32, #tpu.memory_space<vmem>>, %arg4: memref<512x512xbf16, #tpu.memory_space<vmem>>, %arg5: memref<1x512xf32, #tpu.memory_space<vmem>>, %arg6: memref<512x512xbf16, #tpu.memory_space<vmem>>, %arg7: memref<1x512xf32, #tpu.memory_space<vmem>>, %arg8: memref<512x4xbf16, #tpu.memory_space<vmem>>, %arg9: memref<512x4xbf16, #tpu.memory_space<vmem>>, %arg10: memref<1x4xf32, #tpu.memory_space<vmem>>, %arg11: memref<8x4xf32, #tpu.memory_space<vmem>>) attributes {dimension_semantics = [#tpu.dimension_semantics<parallel>], iteration_bounds = array<i64: 1>, scalar_prefetch = 0 : i64, scratch_operands = 0 : i64, tpu.core_type = #tpu.core_type<tc>, window_params = [{transform_indices = @transform_0, window_bounds = array<i64: 8, 32>}, {pipeline_mode = #tpu.pipeline_mode<synchronous>, transform_indices = @transform_1, window_bounds = array<i64: 32, 1024>}, {pipeline_mode = #tpu.pipeline_mode<synchronous>, transform_indices = @transform_2, window_bounds = array<i64: 1, 1024>}, {pipeline_mode = #tpu.pipeline_mode<synchronous>, transform_indices = @transform_3, window_bounds = array<i64: 512, 512>}, {pipeline_mode = #tpu.pipeline_mode<synchronous>, transform_indices = @transform_4, window_bounds = array<i64: 1, 512>}, {pipeline_mode = #tpu.pipeline_mode<synchronous>, transform_indices = @transform_5, window_bounds = array<i64: 512, 512>}, {pipeline_mode = #tpu.pipeline_mode<synchronous>, transform_indices = @transform_6, window_bounds = array<i64: 1, 512>}, {pipeline_mode = #tpu.pipeline_mode<synchronous>, transform_indices = @transform_7, window_bounds = array<i64: 512, 4>}, {pipeline_mode = #tpu.pipeline_mode<synchronous>, transform_indices = @transform_8, window_bounds = array<i64: 512, 4>}, {pipeline_mode = #tpu.pipeline_mode<synchronous>, transform_indices = @transform_9, window_bounds = array<i64: 1, 4>}, {transform_indices = @transform_10, window_bounds = array<i64: 8, 4>}]} {
    %c0 = arith.constant 0 : index
    %c0_0 = arith.constant 0 : index
    %0 = vector.load %arg1[%c0, %c0_0] : memref<8x32xf32, #tpu.memory_space<vmem>>, vector<8x32xf32>
    %1 = arith.truncf %0 : vector<8x32xf32> to vector<8x32xbf16>
    %c0_1 = arith.constant 0 : index
    %c0_2 = arith.constant 0 : index
    %2 = vector.load %arg2[%c0_1, %c0_2] : memref<32x1024xbf16, #tpu.memory_space<vmem>>, vector<32x1024xbf16>
    %cst = arith.constant dense<0.000000e+00> : vector<8x1024xf32>
    %3 = tpu.matmul %1, %2, %cst {dimension_numbers = #tpu.dot_dimension_numbers<[1], [0], [0], [1], [0, 0, 1, 1], [], []>} : vector<8x32xbf16>, vector<32x1024xbf16>, vector<8x1024xf32> -> vector<8x1024xf32>
    %c0_3 = arith.constant 0 : index
    %c0_4 = arith.constant 0 : index
    %4 = vector.load %arg3[%c0_3, %c0_4] : memref<1x1024xf32, #tpu.memory_space<vmem>>, vector<1x1024xf32>
    %5 = vector.broadcast %4 : vector<1x1024xf32> to vector<8x1024xf32>
    %6 = arith.addf %3, %5 : vector<8x1024xf32>
    %cst_5 = arith.constant 0.000000e+00 : f32
    %7 = vector.broadcast %cst_5 : f32 to vector<8x1024xf32>
    %8 = arith.maximumf %6, %7 : vector<8x1024xf32>
    %9 = arith.truncf %8 : vector<8x1024xf32> to vector<8x1024xbf16>
    %10 = vector.extract_strided_slice %9 {offsets = [0, 0], sizes = [8, 512], strides = [1, 1]} : vector<8x1024xbf16> to vector<8x512xbf16>
    %c0_6 = arith.constant 0 : index
    %c0_7 = arith.constant 0 : index
    %11 = vector.load %arg4[%c0_6, %c0_7] : memref<512x512xbf16, #tpu.memory_space<vmem>>, vector<512x512xbf16>
    %cst_8 = arith.constant dense<0.000000e+00> : vector<8x512xf32>
    %12 = tpu.matmul %10, %11, %cst_8 {dimension_numbers = #tpu.dot_dimension_numbers<[1], [0], [0], [1], [0, 0, 1, 1], [], []>} : vector<8x512xbf16>, vector<512x512xbf16>, vector<8x512xf32> -> vector<8x512xf32>
    %c0_9 = arith.constant 0 : index
    %c0_10 = arith.constant 0 : index
    %13 = vector.load %arg5[%c0_9, %c0_10] : memref<1x512xf32, #tpu.memory_space<vmem>>, vector<1x512xf32>
    %14 = vector.broadcast %13 : vector<1x512xf32> to vector<8x512xf32>
    %15 = arith.addf %12, %14 : vector<8x512xf32>
    %cst_11 = arith.constant 0.000000e+00 : f32
    %16 = vector.broadcast %cst_11 : f32 to vector<8x512xf32>
    %17 = arith.maximumf %15, %16 : vector<8x512xf32>
    %18 = arith.truncf %17 : vector<8x512xf32> to vector<8x512xbf16>
    %19 = vector.extract_strided_slice %9 {offsets = [0, 512], sizes = [8, 512], strides = [1, 1]} : vector<8x1024xbf16> to vector<8x512xbf16>
    %c0_12 = arith.constant 0 : index
    %c0_13 = arith.constant 0 : index
    %20 = vector.load %arg6[%c0_12, %c0_13] : memref<512x512xbf16, #tpu.memory_space<vmem>>, vector<512x512xbf16>
    %cst_14 = arith.constant dense<0.000000e+00> : vector<8x512xf32>
    %21 = tpu.matmul %19, %20, %cst_14 {dimension_numbers = #tpu.dot_dimension_numbers<[1], [0], [0], [1], [0, 0, 1, 1], [], []>} : vector<8x512xbf16>, vector<512x512xbf16>, vector<8x512xf32> -> vector<8x512xf32>
    %c0_15 = arith.constant 0 : index
    %c0_16 = arith.constant 0 : index
    %22 = vector.load %arg7[%c0_15, %c0_16] : memref<1x512xf32, #tpu.memory_space<vmem>>, vector<1x512xf32>
    %23 = vector.broadcast %22 : vector<1x512xf32> to vector<8x512xf32>
    %24 = arith.addf %21, %23 : vector<8x512xf32>
    %cst_17 = arith.constant 0.000000e+00 : f32
    %25 = vector.broadcast %cst_17 : f32 to vector<8x512xf32>
    %26 = arith.maximumf %24, %25 : vector<8x512xf32>
    %27 = arith.truncf %26 : vector<8x512xf32> to vector<8x512xbf16>
    %c0_18 = arith.constant 0 : index
    %c0_19 = arith.constant 0 : index
    %28 = vector.load %arg8[%c0_18, %c0_19] : memref<512x4xbf16, #tpu.memory_space<vmem>>, vector<512x4xbf16>
    %cst_20 = arith.constant dense<0.000000e+00> : vector<8x4xf32>
    %29 = tpu.matmul %18, %28, %cst_20 {dimension_numbers = #tpu.dot_dimension_numbers<[1], [0], [0], [1], [0, 0, 1, 1], [], []>} : vector<8x512xbf16>, vector<512x4xbf16>, vector<8x4xf32> -> vector<8x4xf32>
    %c0_21 = arith.constant 0 : index
    %c0_22 = arith.constant 0 : index
    %30 = vector.load %arg9[%c0_21, %c0_22] : memref<512x4xbf16, #tpu.memory_space<vmem>>, vector<512x4xbf16>
    %cst_23 = arith.constant dense<0.000000e+00> : vector<8x4xf32>
    %31 = tpu.matmul %27, %30, %cst_23 {dimension_numbers = #tpu.dot_dimension_numbers<[1], [0], [0], [1], [0, 0, 1, 1], [], []>} : vector<8x512xbf16>, vector<512x4xbf16>, vector<8x4xf32> -> vector<8x4xf32>
    %32 = arith.addf %29, %31 : vector<8x4xf32>
    %c0_24 = arith.constant 0 : index
    %c0_25 = arith.constant 0 : index
    %33 = vector.load %arg10[%c0_24, %c0_25] : memref<1x4xf32, #tpu.memory_space<vmem>>, vector<1x4xf32>
    %34 = vector.broadcast %33 : vector<1x4xf32> to vector<8x4xf32>
    %35 = arith.addf %32, %34 : vector<8x4xf32>
    %c0_26 = arith.constant 0 : index
    %c0_27 = arith.constant 0 : index
    %36 = vector.load %arg11[%c0_26, %c0_27] : memref<8x4xf32, #tpu.memory_space<vmem>>, vector<8x4xf32>
    tpu.vector_store %arg11[%c0_26, %c0_27], %35 {strides = array<i32>} : memref<8x4xf32, #tpu.memory_space<vmem>>, vector<8x4xf32>,
    return
  }
  func.func @transform_0(%arg0: i32) -> (i32, i32) {
    %c0_i32 = arith.constant 0 : i32
    %c0_i32_0 = arith.constant 0 : i32
    return %arg0, %c0_i32 : i32, i32
  }
  func.func @transform_1(%arg0: i32) -> (i32, i32) {
    %c0_i32 = arith.constant 0 : i32
    %c0_i32_0 = arith.constant 0 : i32
    %c0_i32_1 = arith.constant 0 : i32
    return %c0_i32, %c0_i32_0 : i32, i32
  }
  func.func @transform_2(%arg0: i32) -> (i32, i32) {
    %c0_i32 = arith.constant 0 : i32
    %c0_i32_0 = arith.constant 0 : i32
    %c0_i32_1 = arith.constant 0 : i32
    return %c0_i32, %c0_i32_0 : i32, i32
  }
  func.func @transform_3(%arg0: i32) -> (i32, i32) {
    %c0_i32 = arith.constant 0 : i32
    %c0_i32_0 = arith.constant 0 : i32
    %c0_i32_1 = arith.constant 0 : i32
    return %c0_i32, %c0_i32_0 : i32, i32
  }
  func.func @transform_4(%arg0: i32) -> (i32, i32) {
    %c0_i32 = arith.constant 0 : i32
    %c0_i32_0 = arith.constant 0 : i32
    %c0_i32_1 = arith.constant 0 : i32
    return %c0_i32, %c0_i32_0 : i32, i32
  }
  func.func @transform_5(%arg0: i32) -> (i32, i32) {
    %c0_i32 = arith.constant 0 : i32
    %c0_i32_0 = arith.constant 0 : i32
    %c0_i32_1 = arith.constant 0 : i32
    return %c0_i32, %c0_i32_0 : i32, i32
  }
  func.func @transform_6(%arg0: i32) -> (i32, i32) {
    %c0_i32 = arith.constant 0 : i32
    %c0_i32_0 = arith.constant 0 : i32
    %c0_i32_1 = arith.constant 0 : i32
    return %c0_i32, %c0_i32_0 : i32, i32
  }
  func.func @transform_7(%arg0: i32) -> (i32, i32) {
    %c0_i32 = arith.constant 0 : i32
    %c0_i32_0 = arith.constant 0 : i32
    %c0_i32_1 = arith.constant 0 : i32
    return %c0_i32, %c0_i32_0 : i32, i32
  }
  func.func @transform_8(%arg0: i32) -> (i32, i32) {
    %c0_i32 = arith.constant 0 : i32
    %c0_i32_0 = arith.constant 0 : i32
    %c0_i32_1 = arith.constant 0 : i32
    return %c0_i32, %c0_i32_0 : i32, i32
  }
  func.func @transform_9(%arg0: i32) -> (i32, i32) {
    %c0_i32 = arith.constant 0 : i32
    %c0_i32_0 = arith.constant 0 : i32
    %c0_i32_1 = arith.constant 0 : i32
    return %c0_i32, %c0_i32_0 : i32, i32
  }
  func.func @transform_10(%arg0: i32) -> (i32, i32) {
    %c0_i32 = arith.constant 0 : i32
    %c0_i32_0 = arith.constant 0 : i32
    return %arg0, %c0_i32 : i32, i32
  }
}

</mosaic_0001>

<bundles_post_ra>
// kernel: simple_ff_dqn_forward.1
= control target key start
LH: loop header
LB: loop body
LE: loop exit
PB: predicated region body
PF: predicated region fallthrough
CT: control target
= control target key end

     0   :  { %15 = vsyncpa [#allocation3], 0  ;;  %s4354_s0 = inlined_call_operand.vmem [shape: f32[8,32], index: 0, kind: input, shape index: {}]   ;;  %s4355_s1 = inlined_call_operand.vmem [shape: bf16[32,1024], index: 1, kind: input, shape index: {}]   ;;  %s4356_s2 = inlined_call_operand.vmem [shape: f32[1,1024], index: 2, kind: input, shape index: {}]   ;;  %s4357_s3 = inlined_call_operand.hbm [shape: bf16[512,512], index: 3, kind: input, shape index: {}]   ;;  %s4358_s4 = inlined_call_operand.vmem [shape: f32[1,512], index: 4, kind: input, shape index: {}]   ;;  %s4359_s5 = inlined_call_operand.hbm [shape: bf16[512,512], index: 5, kind: input, shape index: {}]   ;;  %s4360_s6 = inlined_call_operand.vmem [shape: f32[1,512], index: 6, kind: input, shape index: {}]   ;;  %s4361_s7 = inlined_call_operand.vmem [shape: bf16[512,4], index: 7, kind: input, shape index: {}]   ;;  %s4362_s8 = inlined_call_operand.vmem [shape: bf16[512,4], index: 8, kind: input, shape index: {}]   ;;  %s4363_s9 = inlined_call_operand.vmem [shape: f32[1,4], index: 9, kind: input, shape index: {}]   ;;  %s4364_s10 = inlined_call_operand.vmem [shape: f32[8,4], index: 10, kind: output, shape index: {}]  }
   0x1   :  { %16 = vsyncpa [#allocation5], 0  ;;  %s3926_s13 = smov [#allocation2]  }
   0x2   :  { %s28_s14 = sshll.u32 %s3926_s13, 4  ;;  %s29_s14 = int_to_ptr.vmem [resolvable:$true] %s28_s14 }
   0x3   :  { %s3890_s15 = scalar_lea.vmem %s29_s14, 16384  ;;  %p3895_p1 = scmp.lt.s32.totalorder %s29_s14, %s29_s14 }
   0x4   :  { %p3891_p0 = scmp.ne.s32.totalorder %s29_s14, %s3890_s15  ;;  %p3896_p2 = scmp.lt.s32.totalorder %s3890_s15, %s3890_s15 }
   0x6   :  { %p3897_p3 = por %p3896_p2, %p3895_p1 }
   0x8   :  { %p3898_p4 = pnand %p3897_p3, %p3891_p0 }
   0xa   :  { %3901 = shalt.err (!%p3898_p4)
}
   0xb   :  { %s3927_s16 = smov 256   ;;  %s3928_s17 = smov 16  }
   0xc   :  { %34 = dma.hbm_to_vmem [thread:$0]  %s4357_s3, 16384, %s29_s14, [#allocation3], %s3927_s16, %s3927_s16, %s3928_s17  }
   0xd   :  { %s3929_s20 = smov [#allocation4]  }
   0xe   :  { %s42_s21 = sshll.u32 %s3929_s20, 4  ;;  %s43_s21 = int_to_ptr.vmem [resolvable:$true] %s42_s21 }
   0xf   :  { %s3910_s22 = scalar_lea.vmem %s43_s21, 16384  ;;  %p3915_p6 = scmp.lt.s32.totalorder %s43_s21, %s43_s21 }
  0x10   :  { %p3911_p5 = scmp.ne.s32.totalorder %s43_s21, %s3910_s22  ;;  %p3916_p7 = scmp.lt.s32.totalorder %s3910_s22, %s3910_s22 }
  0x12   :  { %p3917_p8 = por %p3916_p7, %p3915_p6 }
  0x14   :  { %p3918_p9 = pnand %p3917_p8, %p3911_p5 }
  0x16   :  { %3921 = shalt.err (!%p3918_p9)
}
  0x17   :  { %48 = dma.hbm_to_vmem [thread:$0]  %s4359_s5, 16384, %s43_s21, [#allocation5], %s3927_s16, %s3927_s16, %s3928_s17  }
  0x18   :  { %3922 = dma.done.wait [#allocation3], 16384  }
  0x19   :  { %3923 = vsyncadd [#allocation3], 4294950912 }
  0x1a   :  { %3924 = dma.done.wait [#allocation5], 16384  }
  0x1b   :  { %3925 = vsyncadd [#allocation5], 4294950912  ;;  %v3930_v0 = vmov 0   ;;  %v74_v1 = vld [vmem:[%s4355_s1 + $0x40] sm:$0xff]  ;;  %v75_v3 = vld [vmem:[%s4355_s1 + $0x48] sm:$0xff]  ;;  %vm204_vm0 = vcmask 261120  }
  0x1c   :  { %240 = vmatprep.mubr.bf16.mxu0 %v3930_v0  ;;  %281 = vmatprep.mubr.bf16.mxu1 %v3930_v0  ;;  %v78_v2 = vld [vmem:[%s4355_s1 + $0x60] sm:$0xff]  ;;  %v79_v5 = vld [vmem:[%s4355_s1 + $0x68] sm:$0xff]  ;;  %v76_v15 = vld [vmem:[%s4355_s1 + $0x50] sm:$0xff]  ;;  %vm2992_vm1 = vcmask 31744  }
  0x1d   :  { %v3009_v4 = vcombine.high %v74_v1, %v78_v2  ;;  %v3008_v6 = vcombine.low %v74_v1, %v78_v2  ;;  %v66_v7 = vld [vmem:[%s4355_s1] sm:$0xff]  ;;  %v3011_v9 = vcombine.high %v75_v3, %v79_v5  ;;  %v3010_v10 = vcombine.low %v75_v3, %v79_v5  ;;  %v67_v12 = vld [vmem:[%s4355_s1 + $0x8] sm:$0xff]  ;;  %v80_v16 = vld [vmem:[%s4355_s1 + $0x70] sm:$0xff] }
  0x1e   :  { %v70_v8 = vld [vmem:[%s4355_s1 + $0x20] sm:$0xff]  ;;  %v71_v13 = vld [vmem:[%s4355_s1 + $0x28] sm:$0xff]  ;;  %v77_v17 = vld [vmem:[%s4355_s1 + $0x58] sm:$0xff]  ;;  %v3013_v22 = vcombine.high %v76_v15, %v80_v16  ;;  %v3012_v29 = vcombine.low %v76_v15, %v80_v16 }
  0x1f   :  { %v3001_v11 = vcombine.high %v66_v7, %v70_v8  ;;  %220 = vmatprep.subr.bf16.mxu0 %v3009_v4  ;;  %v3003_v14 = vcombine.high %v67_v12, %v71_v13  ;;  %261 = vmatprep.subr.bf16.mxu1 %v3011_v9  ;;  %v3000_v18 = vcombine.low %v66_v7, %v70_v8  ;;  %v64_v19 = vld [vmem:[%s4354_s0] sm:$0xff]  ;;  %v81_v20 = vld [vmem:[%s4355_s1 + $0x78] sm:$0xff]  ;;  %v68_v23 = vld [vmem:[%s4355_s1 + $0x10] sm:$0xff] }
  0x20   :  { %221 = vmatpush1.bf16.msra.mxu0 %v3008_v6  ;;  %262 = vmatpush1.bf16.msra.mxu1 %v3010_v10  ;;  %v3002_v21 = vcombine.low %v67_v12, %v71_v13  ;;  %v3015_v24 = vcombine.high %v77_v17, %v81_v20  ;;  %v72_v25 = vld [vmem:[%s4355_s1 + $0x30] sm:$0xff]  ;;  %v69_v26 = vld [vmem:[%s4355_s1 + $0x18] sm:$0xff]  ;;  %v65_v27 = vpack.c.bf16 %v64_v19, %v64_v19 }
  0x21   :  { %222 = vmatprep.subr.bf16.mxu0 %v3001_v11  ;;  %263 = vmatprep.subr.bf16.mxu1 %v3003_v14  ;;  %v73_v28 = vld [vmem:[%s4355_s1 + $0x38] sm:$0xff]  ;;  %v3014_v30 = vcombine.low %v77_v17, %v81_v20  ;;  %v3005_v31 = vcombine.high %v68_v23, %v72_v25  ;;  %v3004_v33 = vcombine.low %v68_v23, %v72_v25  ;;  %v3436_v35 = vld [vmem:[#allocation2 + $0xe4] ss:$16 sps:$4 sm:$0xff]   ;;  %v3434_v37 = vld [vmem:[#allocation2 + $0xe0] ss:$16 sps:$4 sm:$0xff]  }
  0x22   :  { %v3007_v32 = vcombine.high %v69_v26, %v73_v28  ;;  %v3006_v34 = vcombine.low %v69_v26, %v73_v28  ;;  %v3439_v36 = vld [vmem:[#allocation2 + $0x2e4] ss:$16 sps:$4 sm:$0xff]   ;;  %v3437_v38 = vld [vmem:[#allocation2 + $0x2e0] ss:$16 sps:$4 sm:$0xff]  }
  0x23   :  { %v3442_v39 = vld [vmem:[#allocation2 + $0xc4] ss:$16 sps:$4 sm:$0xff]   ;;  %v3440_v41 = vld [vmem:[#allocation2 + $0xc0] ss:$16 sps:$4 sm:$0xff]  }
  0x24   :  { %223 = vmatpush1.bf16.msra.mxu0 %v3000_v18  ;;  %264 = vmatpush1.bf16.msra.mxu1 %v3002_v21  ;;  %v3445_v40 = vld [vmem:[#allocation2 + $0x2c4] ss:$16 sps:$4 sm:$0xff]   ;;  %v3443_v42 = vld [vmem:[#allocation2 + $0x2c0] ss:$16 sps:$4 sm:$0xff]  }
  0x25   :  { %302 = vmatprep.subr.bf16.mxu0 %v3013_v22  ;;  %343 = vmatprep.subr.bf16.mxu1 %v3015_v24  ;;  %v3448_v43 = vld [vmem:[#allocation2 + $0xa4] ss:$16 sps:$4 sm:$0xff]   ;;  %v3446_v45 = vld [vmem:[#allocation2 + $0xa0] ss:$16 sps:$4 sm:$0xff]  }
  0x26   :  { %v3451_v44 = vld [vmem:[#allocation2 + $0x2a4] ss:$16 sps:$4 sm:$0xff]   ;;  %v3449_v46 = vld [vmem:[#allocation2 + $0x2a0] ss:$16 sps:$4 sm:$0xff]  }
  0x27   :  { %3016 = vmatmul.mubr.msk.bf16.vlgmr.msra.gmra.mxu0 %vm204_vm0, %v65_v27  ;;  %3017 = vmatmul.mubr.msk.bf16.vlgmr.msra.gmra.mxu1 %vm204_vm0, %v65_v27  ;;  %v3454_v47 = vld [vmem:[#allocation2 + $0x84] ss:$16 sps:$4 sm:$0xff]   ;;  %v3452_v49 = vld [vmem:[#allocation2 + $0x80] ss:$16 sps:$4 sm:$0xff]  }
  0x28   :  { %303 = vmatpush1.bf16.msra.mxu0 %v3012_v29  ;;  %344 = vmatpush1.bf16.msra.mxu1 %v3014_v30  ;;  %v3457_v48 = vld [vmem:[#allocation2 + $0x284] ss:$16 sps:$4 sm:$0xff]   ;;  %v3455_v50 = vld [vmem:[#allocation2 + $0x280] ss:$16 sps:$4 sm:$0xff]  }
  0x29   :  { %304 = vmatprep.subr.bf16.mxu0 %v3005_v31  ;;  %345 = vmatprep.subr.bf16.mxu1 %v3007_v32  ;;  %v3460_v51 = vld [vmem:[#allocation2 + $0x64] ss:$16 sps:$4 sm:$0xff]   ;;  %v3458_v53 = vld [vmem:[#allocation2 + $0x60] ss:$16 sps:$4 sm:$0xff]  }
  0x2a   :  { %322 = vmatprep.mubr.bf16.mxu0 %v3930_v0  ;;  %363 = vmatprep.mubr.bf16.mxu1 %v3930_v0  ;;  %v3463_v52 = vld [vmem:[#allocation2 + $0x264] ss:$16 sps:$4 sm:$0xff]   ;;  %v3461_v54 = vld [vmem:[#allocation2 + $0x260] ss:$16 sps:$4 sm:$0xff]  }
  0x2b   :  { %v3466_v55 = vld [vmem:[#allocation2 + $0x44] ss:$16 sps:$4 sm:$0xff]   ;;  %v3464_v57 = vld [vmem:[#allocation2 + $0x40] ss:$16 sps:$4 sm:$0xff]  }
  0x2c   :  { %305 = vmatpush1.bf16.msra.mxu0 %v3004_v33  ;;  %346 = vmatpush1.bf16.msra.mxu1 %v3006_v34  ;;  %v3469_v56 = vld [vmem:[#allocation2 + $0x244] ss:$16 sps:$4 sm:$0xff]   ;;  %v3467_v58 = vld [vmem:[#allocation2 + $0x240] ss:$16 sps:$4 sm:$0xff]  }
  0x2d   :  { %1178 = vmatprep.subr.bf16.mxu0 %v3436_v35  ;;  %1219 = vmatprep.subr.bf16.mxu1 %v3439_v36  ;;  %v3472_v59 = vld [vmem:[#allocation2 + $0x24] ss:$16 sps:$4 sm:$0xff]   ;;  %v3470_v61 = vld [vmem:[#allocation2 + $0x20] ss:$16 sps:$4 sm:$0xff]   ;;  %v3532_v35 = vld [vmem:[#allocation2 + $0xec] ss:$16 sps:$4 sm:$0xff]  }
  0x2e   :  { %v3475_v60 = vld [vmem:[#allocation2 + $0x224] ss:$16 sps:$4 sm:$0xff]   ;;  %v3473_v62 = vld [vmem:[#allocation2 + $0x220] ss:$16 sps:$4 sm:$0xff]   ;;  %v3535_v36 = vld [vmem:[#allocation2 + $0x2ec] ss:$16 sps:$4 sm:$0xff]  }
  0x2f   :  { %3018 = vmatmul.mubr.msk.bf16.vlgmr.msra.gmra.mxu0 %vm204_vm0, %v65_v27  ;;  %3019 = vmatmul.mubr.msk.bf16.vlgmr.msra.gmra.mxu1 %vm204_vm0, %v65_v27  ;;  %v3478_v63 = vld [vmem:[#allocation2 + $0x4] ss:$16 sps:$4 sm:$0xff]   ;;  %v3476_v0 = vld [vmem:[#allocation2] ss:$16 sps:$4 sm:$0xff]  }
  0x30   :  { %1179 = vmatpush1.bf16.msra.mxu0 %v3434_v37  ;;  %1220 = vmatpush1.bf16.msra.mxu1 %v3437_v38  ;;  %v3481_v1 = vld [vmem:[#allocation2 + $0x204] ss:$16 sps:$4 sm:$0xff]   ;;  %v3479_v2 = vld [vmem:[#allocation2 + $0x200] ss:$16 sps:$4 sm:$0xff]   ;;  %v84_v37 = vlaneseq }
  0x31   :  { %1180 = vmatprep.subr.bf16.mxu0 %v3442_v39  ;;  %1221 = vmatprep.subr.bf16.mxu1 %v3445_v40  ;;  %v3484_v3 = vld [vmem:[#allocation2 + $0x1e4] ss:$16 sps:$4 sm:$0xff]   ;;  %v3482_v5 = vld [vmem:[#allocation2 + $0x1e0] ss:$16 sps:$4 sm:$0xff]  }
  0x32   :  { %v3487_v4 = vld [vmem:[#allocation2 + $0x3e4] ss:$16 sps:$4 sm:$0xff]   ;;  %v3485_v6 = vld [vmem:[#allocation2 + $0x3e0] ss:$16 sps:$4 sm:$0xff]   ;;  %v4047_v38 = vshrl.u32 %v84_v37, 7 }
  0x33   :  { %v3490_v7 = vld [vmem:[#allocation2 + $0x1c4] ss:$16 sps:$4 sm:$0xff]   ;;  %v3488_v9 = vld [vmem:[#allocation2 + $0x1c0] ss:$16 sps:$4 sm:$0xff]   ;;  %v3569_v37 = vld [vmem:[#allocation2 + $0x228] ss:$16 sps:$4 sm:$0xff]  }
  0x34   :  { %1181 = vmatpush1.bf16.msra.mxu0 %v3440_v41  ;;  %1222 = vmatpush1.bf16.msra.mxu1 %v3443_v42  ;;  %v3493_v8 = vld [vmem:[#allocation2 + $0x3c4] ss:$16 sps:$4 sm:$0xff]   ;;  %v3491_v10 = vld [vmem:[#allocation2 + $0x3c0] ss:$16 sps:$4 sm:$0xff]   ;;  %v4050_v39 = vsub.s32 0, %v4047_v38  ;;  %v4058_v41 = vsub.s32 2, %v4047_v38 }
  0x35   :  { %1182 = vmatprep.subr.bf16.mxu0 %v3448_v43  ;;  %1223 = vmatprep.subr.bf16.mxu1 %v3451_v44  ;;  %v3496_v11 = vld [vmem:[#allocation2 + $0x1a4] ss:$16 sps:$4 sm:$0xff]   ;;  %v3494_v13 = vld [vmem:[#allocation2 + $0x1a0] ss:$16 sps:$4 sm:$0xff]   ;;  %v4061_v42 = vsub.s32 1, %v4047_v38  ;;  %v4064_v43 = vsub.s32 3, %v4047_v38 }
  0x36   :  { %v3499_v12 = vld [vmem:[#allocation2 + $0x3a4] ss:$16 sps:$4 sm:$0xff]   ;;  %v3497_v14 = vld [vmem:[#allocation2 + $0x3a0] ss:$16 sps:$4 sm:$0xff]  }
  0x37   :  { %v3502_v15 = vld [vmem:[#allocation2 + $0x184] ss:$16 sps:$4 sm:$0xff]   ;;  %v3500_v17 = vld [vmem:[#allocation2 + $0x180] ss:$16 sps:$4 sm:$0xff]  }
  0x38   :  { %1183 = vmatpush1.bf16.msra.mxu0 %v3446_v45  ;;  %1224 = vmatpush1.bf16.msra.mxu1 %v3449_v46  ;;  %v3505_v16 = vld [vmem:[#allocation2 + $0x384] ss:$16 sps:$4 sm:$0xff]   ;;  %v3503_v18 = vld [vmem:[#allocation2 + $0x380] ss:$16 sps:$4 sm:$0xff]  }
  0x39   :  { %1184 = vmatprep.subr.bf16.mxu0 %v3454_v47  ;;  %1225 = vmatprep.subr.bf16.mxu1 %v3457_v48  ;;  %v3508_v19 = vld [vmem:[#allocation2 + $0x164] ss:$16 sps:$4 sm:$0xff]   ;;  %v3506_v21 = vld [vmem:[#allocation2 + $0x160] ss:$16 sps:$4 sm:$0xff]  }
  0x3a   :  { %v3511_v20 = vld [vmem:[#allocation2 + $0x364] ss:$16 sps:$4 sm:$0xff]   ;;  %v3509_v22 = vld [vmem:[#allocation2 + $0x360] ss:$16 sps:$4 sm:$0xff]  }
  0x3b   :  { %v3514_v23 = vld [vmem:[#allocation2 + $0x144] ss:$16 sps:$4 sm:$0xff]   ;;  %v3512_v25 = vld [vmem:[#allocation2 + $0x140] ss:$16 sps:$4 sm:$0xff]  }
  0x3c   :  { %1185 = vmatpush1.bf16.msra.mxu0 %v3452_v49  ;;  %1226 = vmatpush1.bf16.msra.mxu1 %v3455_v50  ;;  %v3517_v24 = vld [vmem:[#allocation2 + $0x344] ss:$16 sps:$4 sm:$0xff]   ;;  %v3515_v26 = vld [vmem:[#allocation2 + $0x340] ss:$16 sps:$4 sm:$0xff]  }
  0x3d   :  { %1186 = vmatprep.subr.bf16.mxu0 %v3460_v51  ;;  %1227 = vmatprep.subr.bf16.mxu1 %v3463_v52  ;;  %v3520_v27 = vld [vmem:[#allocation2 + $0x124] ss:$16 sps:$4 sm:$0xff]   ;;  %v3518_v29 = vld [vmem:[#allocation2 + $0x120] ss:$16 sps:$4 sm:$0xff]  }
  0x3e   :  { %v3523_v28 = vld [vmem:[#allocation2 + $0x324] ss:$16 sps:$4 sm:$0xff]   ;;  %v3521_v30 = vld [vmem:[#allocation2 + $0x320] ss:$16 sps:$4 sm:$0xff]  }
  0x3f   :  { %v3526_v31 = vld [vmem:[#allocation2 + $0x104] ss:$16 sps:$4 sm:$0xff]   ;;  %v3524_v33 = vld [vmem:[#allocation2 + $0x100] ss:$16 sps:$4 sm:$0xff]  }
  0x40   :  { %1187 = vmatpush1.bf16.msra.mxu0 %v3458_v53  ;;  %1228 = vmatpush1.bf16.msra.mxu1 %v3461_v54  ;;  %v3529_v32 = vld [vmem:[#allocation2 + $0x304] ss:$16 sps:$4 sm:$0xff]   ;;  %v3527_v34 = vld [vmem:[#allocation2 + $0x300] ss:$16 sps:$4 sm:$0xff]  }
  0x41   :  { %1188 = vmatprep.subr.bf16.mxu0 %v3466_v55  ;;  %1229 = vmatprep.subr.bf16.mxu1 %v3469_v56  ;;  %v4055_v40 = vld [vmem:[%s4356_s2] sm:$0xff] }
  0x42   :  { %v87_v44 = vrot.slane %v4055_v40, %v4050_v39  ;;  %v95_v45 = vrot.slane %v4055_v40, %v4058_v41  ;;  %v91_v46 = vrot.slane %v4055_v40, %v4061_v42  ;;  %v99_v48 = vrot.slane %v4055_v40, %v4064_v43 }
  0x44   :  { %1189 = vmatpush1.bf16.msra.mxu0 %v3464_v57  ;;  %1230 = vmatpush1.bf16.msra.mxu1 %v3467_v58 }
  0x45   :  { %1190 = vmatprep.subr.bf16.mxu0 %v3472_v59  ;;  %1231 = vmatprep.subr.bf16.mxu1 %v3475_v60 }
  0x48   :  { %1191 = vmatpush1.bf16.msra.mxu0 %v3470_v61  ;;  %1232 = vmatpush1.bf16.msra.mxu1 %v3473_v62 }
  0x49   :  { %1192 = vmatprep.subr.bf16.mxu0 %v3478_v63  ;;  %1233 = vmatprep.subr.bf16.mxu1 %v3481_v1 }
  0x4c   :  { %1193 = vmatpush1.bf16.msra.mxu0 %v3476_v0  ;;  %1234 = vmatpush1.bf16.msra.mxu1 %v3479_v2  ;;  %v3530_v2 = vld [vmem:[#allocation2 + $0xe8] ss:$16 sps:$4 sm:$0xff]  }
  0x4d   :  { %1194 = vmatprep.subr.bf16.mxu0 %v3484_v3  ;;  %1235 = vmatprep.subr.bf16.mxu1 %v3487_v4 }
  0x50   :  { %1195 = vmatpush2.bf16.msra.mxu0 %v3482_v5  ;;  %1236 = vmatpush2.bf16.msra.mxu1 %v3485_v6  ;;  %v3533_v5 = vld [vmem:[#allocation2 + $0x2e8] ss:$16 sps:$4 sm:$0xff]  }
  0x51   :  { %1196 = vmatprep.subr.bf16.mxu0 %v3490_v7  ;;  %1237 = vmatprep.subr.bf16.mxu1 %v3493_v8  ;;  %v3538_v7 = vld [vmem:[#allocation2 + $0xcc] ss:$16 sps:$4 sm:$0xff]  }
  0x54   :  { %1197 = vmatpush2.bf16.msra.mxu0 %v3488_v9  ;;  %1238 = vmatpush2.bf16.msra.mxu1 %v3491_v10  ;;  %v3541_v9 = vld [vmem:[#allocation2 + $0x2cc] ss:$16 sps:$4 sm:$0xff]  }
  0x55   :  { %1198 = vmatprep.subr.bf16.mxu0 %v3496_v11  ;;  %1239 = vmatprep.subr.bf16.mxu1 %v3499_v12  ;;  %v3536_v11 = vld [vmem:[#allocation2 + $0xc8] ss:$16 sps:$4 sm:$0xff]  }
  0x58   :  { %1199 = vmatpush2.bf16.msra.mxu0 %v3494_v13  ;;  %1240 = vmatpush2.bf16.msra.mxu1 %v3497_v14  ;;  %v3539_v13 = vld [vmem:[#allocation2 + $0x2c8] ss:$16 sps:$4 sm:$0xff]   ;;  %v3544_v14 = vld [vmem:[#allocation2 + $0xac] ss:$16 sps:$4 sm:$0xff]  }
  0x59   :  { %1200 = vmatprep.subr.bf16.mxu0 %v3502_v15  ;;  %1241 = vmatprep.subr.bf16.mxu1 %v3505_v16  ;;  %v3547_v16 = vld [vmem:[#allocation2 + $0x2ac] ss:$16 sps:$4 sm:$0xff]  }
  0x5c   :  { %1201 = vmatpush2.bf16.msra.mxu0 %v3500_v17  ;;  %1242 = vmatpush2.bf16.msra.mxu1 %v3503_v18 }
  0x5d   :  { %1202 = vmatprep.subr.bf16.mxu0 %v3508_v19  ;;  %1243 = vmatprep.subr.bf16.mxu1 %v3511_v20  ;;  %v3542_v19 = vld [vmem:[#allocation2 + $0xa8] ss:$16 sps:$4 sm:$0xff]  }
  0x60   :  { %1203 = vmatpush2.bf16.msra.mxu0 %v3506_v21  ;;  %1244 = vmatpush2.bf16.msra.mxu1 %v3509_v22  ;;  %v3545_v21 = vld [vmem:[#allocation2 + $0x2a8] ss:$16 sps:$4 sm:$0xff]   ;;  %v3550_v22 = vld [vmem:[#allocation2 + $0x8c] ss:$16 sps:$4 sm:$0xff]  }
  0x61   :  { %1204 = vmatprep.subr.bf16.mxu0 %v3514_v23  ;;  %1245 = vmatprep.subr.bf16.mxu1 %v3517_v24  ;;  %v3553_v23 = vld [vmem:[#allocation2 + $0x28c] ss:$16 sps:$4 sm:$0xff]   ;;  %v3548_v24 = vld [vmem:[#allocation2 + $0x88] ss:$16 sps:$4 sm:$0xff]  }
  0x64   :  { %1205 = vmatpush2.bf16.msra.mxu0 %v3512_v25  ;;  %1246 = vmatpush2.bf16.msra.mxu1 %v3515_v26  ;;  %v3551_v25 = vld [vmem:[#allocation2 + $0x288] ss:$16 sps:$4 sm:$0xff]   ;;  %v3556_v26 = vld [vmem:[#allocation2 + $0x6c] ss:$16 sps:$4 sm:$0xff]  }
  0x65   :  { %1206 = vmatprep.subr.bf16.mxu0 %v3520_v27  ;;  %1247 = vmatprep.subr.bf16.mxu1 %v3523_v28  ;;  %v3559_v27 = vld [vmem:[#allocation2 + $0x26c] ss:$16 sps:$4 sm:$0xff]   ;;  %v3554_v28 = vld [vmem:[#allocation2 + $0x68] ss:$16 sps:$4 sm:$0xff]  }
  0x68   :  { %1207 = vmatpush2.bf16.msra.mxu0 %v3518_v29  ;;  %1248 = vmatpush2.bf16.msra.mxu1 %v3521_v30  ;;  %v3557_v29 = vld [vmem:[#allocation2 + $0x268] ss:$16 sps:$4 sm:$0xff]   ;;  %v3562_v30 = vld [vmem:[#allocation2 + $0x4c] ss:$16 sps:$4 sm:$0xff]  }
  0x69   :  { %1208 = vmatprep.subr.bf16.mxu0 %v3526_v31  ;;  %1249 = vmatprep.subr.bf16.mxu1 %v3529_v32  ;;  %v3565_v31 = vld [vmem:[#allocation2 + $0x24c] ss:$16 sps:$4 sm:$0xff]   ;;  %v3560_v32 = vld [vmem:[#allocation2 + $0x48] ss:$16 sps:$4 sm:$0xff]  }
  0x6c   :  { %1209 = vmatpush2.bf16.msra.mxu0 %v3524_v33  ;;  %1250 = vmatpush2.bf16.msra.mxu1 %v3527_v34  ;;  %v3563_v33 = vld [vmem:[#allocation2 + $0x248] ss:$16 sps:$4 sm:$0xff]   ;;  %v3568_v34 = vld [vmem:[#allocation2 + $0x2c] ss:$16 sps:$4 sm:$0xff]  }
  0x6d   :  { %1260 = vmatprep.subr.bf16.mxu0 %v3532_v35  ;;  %1301 = vmatprep.subr.bf16.mxu1 %v3535_v36  ;;  %v3571_v35 = vld [vmem:[#allocation2 + $0x22c] ss:$16 sps:$4 sm:$0xff]   ;;  %v3566_v36 = vld [vmem:[#allocation2 + $0x28] ss:$16 sps:$4 sm:$0xff]  }
  0xe7   :  { %v242_v47 = vpop.f32.mrf.mxu0  ;;  %v283_v50 = vpop.f32.mrf.mxu1 }
  0xe8   :  { %v243_v49 = vadd.f32 %v242_v47, %v87_v44  ;;  %v284_v51 = vadd.f32 %v283_v50, %v95_v45  ;;  %v3574_v44 = vld [vmem:[#allocation2 + $0xc] ss:$16 sps:$4 sm:$0xff]   ;;  %v3575_v47 = vld [vmem:[#allocation2 + $0x208] ss:$16 sps:$4 sm:$0xff]  }
  0xe9   :  { %v244_v52 = vpop.f32.mrf.mxu0  ;;  %v285_v54 = vpop.f32.mrf.mxu1  ;;  %v3577_v45 = vld [vmem:[#allocation2 + $0x20c] ss:$16 sps:$4 sm:$0xff]   ;;  %v3578_v50 = vld [vmem:[#allocation2 + $0x1e8] ss:$16 sps:$4 sm:$0xff]  }
  0xea   :  { %v245_v53 = vadd.f32 %v244_v52, %v91_v46  ;;  %v372_v55 = vmax.f32 %v243_v49, 0.0  ;;  %v374_v56 = vmax.f32 %v284_v51, 0.0  ;;  %v286_v57 = vadd.f32 %v285_v54, %v99_v48  ;;  %v3572_v46 = vld [vmem:[#allocation2 + $0x8] ss:$16 sps:$4 sm:$0xff]   ;;  %v3580_v48 = vld [vmem:[#allocation2 + $0x1ec] ss:$16 sps:$4 sm:$0xff]  }
  0xeb   :  { %v246_v58 = vpop.f32.mrf.mxu0  ;;  %v287_v60 = vpop.f32.mrf.mxu1  ;;  %v3583_v49 = vld [vmem:[#allocation2 + $0x3ec] ss:$16 sps:$4 sm:$0xff]   ;;  %v3581_v51 = vld [vmem:[#allocation2 + $0x3e8] ss:$16 sps:$4 sm:$0xff]  }
  0xec   :  { %v373_v59 = vmax.f32 %v245_v53, 0.0  ;;  %v375_v61 = vmax.f32 %v286_v57, 0.0  ;;  %v4074_v63 = vpack.c.bf16 %v374_v56, %v374_v56  ;;  %v4076_v3 = vpack.c.bf16 %v372_v55, %v372_v55  ;;  %v3586_v52 = vld [vmem:[#allocation2 + $0x1cc] ss:$16 sps:$4 sm:$0xff]   ;;  %v3584_v54 = vld [vmem:[#allocation2 + $0x1c8] ss:$16 sps:$4 sm:$0xff]  }
  0xed   :  { %v247_v62 = vpop.f32.mrf.mxu0  ;;  %v288_v1 = vpop.f32.mrf.mxu1  ;;  %v3589_v53 = vld [vmem:[#allocation2 + $0x3cc] ss:$16 sps:$4 sm:$0xff]   ;;  %v3587_v55 = vld [vmem:[#allocation2 + $0x3c8] ss:$16 sps:$4 sm:$0xff]  }
  0xee   :  { %v381_v0 = vpack.c.bf16 %v373_v59, %v373_v59  ;;  %v383_v4 = vpack.c.bf16 %v375_v61, %v375_v61  ;;  %v3592_v56 = vld [vmem:[#allocation2 + $0x1ac] ss:$16 sps:$4 sm:$0xff]   ;;  %v3590_v58 = vld [vmem:[#allocation2 + $0x1a8] ss:$16 sps:$4 sm:$0xff]  }
  0xef   :  { %v4078_v6 = vpop.f32.mrf.mxu0  ;;  %v4080_v8 = vpop.f32.mrf.mxu1  ;;  %v3595_v57 = vld [vmem:[#allocation2 + $0x3ac] ss:$16 sps:$4 sm:$0xff]   ;;  %v3593_v59 = vld [vmem:[#allocation2 + $0x3a8] ss:$16 sps:$4 sm:$0xff]  }
  0xf0   :  { %1210 = vmatprep.mubr.bf16.mxu0 %v381_v0  ;;  %1251 = vmatprep.mubr.bf16.mxu1 %v383_v4  ;;  %v3598_v60 = vld [vmem:[#allocation2 + $0x18c] ss:$16 sps:$4 sm:$0xff]   ;;  %v3596_v62 = vld [vmem:[#allocation2 + $0x188] ss:$16 sps:$4 sm:$0xff]  }
  0xf1   :  { %1211 = vmatmul.mubr.bf16.vlgmr.msra.gmra.mxu0 %v4076_v3  ;;  %v4083_v10 = vpop.f32.mrf.mxu0  ;;  %1252 = vmatmul.mubr.bf16.vlgmr.msra.gmra.mxu1 %v4074_v63  ;;  %v4086_v12 = vpop.f32.mrf.mxu1  ;;  %v3601_v61 = vld [vmem:[#allocation2 + $0x38c] ss:$16 sps:$4 sm:$0xff]  }
  0xf2   :  { %1261 = vmatpush1.bf16.msra.mxu0 %v3530_v2  ;;  %1302 = vmatpush1.bf16.msra.mxu1 %v3533_v5  ;;  %v3604_v1 = vld [vmem:[#allocation2 + $0x16c] ss:$16 sps:$4 sm:$0xff]   ;;  %v3605_v5 = vld [vmem:[#allocation2 + $0x368] ss:$16 sps:$4 sm:$0xff]  }
  0xf3   :  { %1292 = vmatprep.mubr.bf16.mxu0 %v381_v0  ;;  %v328_v15 = vpop.f32.mrf.mxu0  ;;  %1333 = vmatprep.mubr.bf16.mxu1 %v383_v4  ;;  %v369_v17 = vpop.f32.mrf.mxu1  ;;  %v3599_v0 = vld [vmem:[#allocation2 + $0x388] ss:$16 sps:$4 sm:$0xff]   ;;  %v3607_v2 = vld [vmem:[#allocation2 + $0x36c] ss:$16 sps:$4 sm:$0xff]  }
  0xf4   :  { %1262 = vmatprep.subr.bf16.mxu0 %v3538_v7  ;;  %1303 = vmatprep.subr.bf16.mxu1 %v3541_v9  ;;  %v3602_v4 = vld [vmem:[#allocation2 + $0x168] ss:$16 sps:$4 sm:$0xff]   ;;  %v3610_v7 = vld [vmem:[#allocation2 + $0x14c] ss:$16 sps:$4 sm:$0xff]  }
  0xf5   :  { %v329_v18 = vpop.f32.mrf.mxu0  ;;  %v370_v20 = vpop.f32.mrf.mxu1  ;;  %v3613_v9 = vld [vmem:[#allocation2 + $0x34c] ss:$16 sps:$4 sm:$0xff]   ;;  %v3611_v15 = vld [vmem:[#allocation2 + $0x348] ss:$16 sps:$4 sm:$0xff]  }
  0xf6   :  { %1263 = vmatpush1.bf16.msra.mxu0 %v3536_v11  ;;  %1304 = vmatpush1.bf16.msra.mxu1 %v3539_v13  ;;  %v106_v11 = vsub.s32 5, %v4047_v38  ;;  %v114_v13 = vsub.s32 7, %v4047_v38  ;;  %v3619_v17 = vld [vmem:[#allocation2 + $0x32c] ss:$16 sps:$4 sm:$0xff]   ;;  %v3614_v20 = vld [vmem:[#allocation2 + $0x128] ss:$16 sps:$4 sm:$0xff]  }
  0xf7   :  { %1264 = vmatprep.subr.bf16.mxu0 %v3544_v14  ;;  %1305 = vmatprep.subr.bf16.mxu1 %v3547_v16  ;;  %v3608_v14 = vld [vmem:[#allocation2 + $0x148] ss:$16 sps:$4 sm:$0xff]   ;;  %v3616_v16 = vld [vmem:[#allocation2 + $0x12c] ss:$16 sps:$4 sm:$0xff]  }
  0xf8   :  { %v107_v18 = vrot.slane %v4055_v40, %v106_v11  ;;  %v3682_v11 = vld [vmem:[#allocation4 + $0x1c4] ss:$16 sps:$4 sm:$0xff]  }
  0xfa   :  { %1265 = vmatpush1.bf16.msra.mxu0 %v3542_v19  ;;  %1306 = vmatpush1.bf16.msra.mxu1 %v3545_v21  ;;  %v115_v19 = vrot.slane %v4055_v40, %v114_v13  ;;  %v3617_v21 = vld [vmem:[#allocation2 + $0x328] ss:$16 sps:$4 sm:$0xff]   ;;  %v3685_v13 = vld [vmem:[#allocation4 + $0x3c4] ss:$16 sps:$4 sm:$0xff]  }
  0xfb   :  { %1266 = vmatprep.subr.bf16.mxu0 %v3550_v22  ;;  %1307 = vmatprep.subr.bf16.mxu1 %v3553_v23  ;;  %v3622_v22 = vld [vmem:[#allocation2 + $0x10c] ss:$16 sps:$4 sm:$0xff]  }
  0xfc   :  { %v3625_v23 = vld [vmem:[#allocation2 + $0x30c] ss:$16 sps:$4 sm:$0xff]  }
  0xfe   :  { %1267 = vmatpush1.bf16.msra.mxu0 %v3548_v24  ;;  %1308 = vmatpush1.bf16.msra.mxu1 %v3551_v25  ;;  %v327_v24 = vadd.f32 %v4083_v10, %v107_v18  ;;  %v368_v25 = vadd.f32 %v4086_v12, %v115_v19  ;;  %v3637_v10 = vld [vmem:[#allocation4 + $0x2c4] ss:$16 sps:$4 sm:$0xff]   ;;  %v3686_v18 = vld [vmem:[#allocation4 + $0x1a0] ss:$16 sps:$4 sm:$0xff]  }
  0xff   :  { %1268 = vmatprep.subr.bf16.mxu0 %v3556_v26  ;;  %1309 = vmatprep.subr.bf16.mxu1 %v3559_v27  ;;  %v3620_v26 = vld [vmem:[#allocation2 + $0x108] ss:$16 sps:$4 sm:$0xff]   ;;  %v3689_v19 = vld [vmem:[#allocation4 + $0x3a0] ss:$16 sps:$4 sm:$0xff]  }
 0x100   :  { %v3623_v27 = vld [vmem:[#allocation2 + $0x308] ss:$16 sps:$4 sm:$0xff]  }
 0x102   :  { %1269 = vmatpush1.bf16.msra.mxu0 %v3554_v28  ;;  %1310 = vmatpush1.bf16.msra.mxu1 %v3557_v29  ;;  %v3628_v28 = vld [vmem:[#allocation4 + $0xe4] ss:$16 sps:$4 sm:$0xff]  }
 0x103   :  { %1270 = vmatprep.subr.bf16.mxu0 %v3562_v30  ;;  %1311 = vmatprep.subr.bf16.mxu1 %v3565_v31  ;;  %v3631_v29 = vld [vmem:[#allocation4 + $0x2e4] ss:$16 sps:$4 sm:$0xff]   ;;  %v377_v30 = vmax.f32 %v327_v24, 0.0  ;;  %v379_v31 = vmax.f32 %v368_v25, 0.0 }
 0x104   :  { %v3700_v24 = vld [vmem:[#allocation4 + $0x164] ss:$16 sps:$4 sm:$0xff]  }
 0x105   :  { %v4097_v12 = vpack.c.bf16 %v379_v31, %v379_v31  ;;  %v3703_v25 = vld [vmem:[#allocation4 + $0x364] ss:$16 sps:$4 sm:$0xff]  }
 0x106   :  { %1271 = vmatpush1.bf16.msra.mxu0 %v3560_v32  ;;  %1312 = vmatpush1.bf16.msra.mxu1 %v3563_v33  ;;  %v3626_v32 = vld [vmem:[#allocation4 + $0xe0] ss:$16 sps:$4 sm:$0xff]   ;;  %v3709_v31 = vld [vmem:[#allocation4 + $0x344] ss:$16 sps:$4 sm:$0xff]  }
 0x107   :  { %1272 = vmatprep.subr.bf16.mxu0 %v3568_v34  ;;  %1313 = vmatprep.subr.bf16.mxu1 %v3571_v35  ;;  %v3629_v33 = vld [vmem:[#allocation4 + $0x2e0] ss:$16 sps:$4 sm:$0xff]   ;;  %v3634_v34 = vld [vmem:[#allocation4 + $0xc4] ss:$16 sps:$4 sm:$0xff]   ;;  %v4094_v35 = vpack.c.bf16 %v377_v30, %v377_v30 }
 0x108   :  { %v3706_v30 = vld [vmem:[#allocation4 + $0x144] ss:$16 sps:$4 sm:$0xff]  }
 0x10a   :  { %1273 = vmatpush1.bf16.msra.mxu0 %v3566_v36  ;;  %1314 = vmatpush1.bf16.msra.mxu1 %v3569_v37  ;;  %v3632_v36 = vld [vmem:[#allocation4 + $0xc0] ss:$16 sps:$4 sm:$0xff]  }
 0x10b   :  { %1274 = vmatprep.subr.bf16.mxu0 %v3574_v44  ;;  %1315 = vmatprep.subr.bf16.mxu1 %v3577_v45  ;;  %v3635_v37 = vld [vmem:[#allocation4 + $0x2c0] ss:$16 sps:$4 sm:$0xff]   ;;  %v3640_v44 = vld [vmem:[#allocation4 + $0xa4] ss:$16 sps:$4 sm:$0xff]  }
 0x10c   :  { %v3643_v45 = vld [vmem:[#allocation4 + $0x2a4] ss:$16 sps:$4 sm:$0xff]  }
 0x10e   :  { %1275 = vmatpush1.bf16.msra.mxu0 %v3572_v46  ;;  %1316 = vmatpush1.bf16.msra.mxu1 %v3575_v47  ;;  %v3638_v46 = vld [vmem:[#allocation4 + $0xa0] ss:$16 sps:$4 sm:$0xff]   ;;  %v3646_v47 = vld [vmem:[#allocation4 + $0x84] ss:$16 sps:$4 sm:$0xff]  }
 0x10f   :  { %1276 = vmatprep.subr.bf16.mxu0 %v3580_v48  ;;  %1317 = vmatprep.subr.bf16.mxu1 %v3583_v49  ;;  %v3644_v48 = vld [vmem:[#allocation4 + $0x80] ss:$16 sps:$4 sm:$0xff]  }
 0x110   :  { %v3647_v49 = vld [vmem:[#allocation4 + $0x280] ss:$16 sps:$4 sm:$0xff]  }
 0x112   :  { %1277 = vmatpush2.bf16.msra.mxu0 %v3578_v50  ;;  %1318 = vmatpush2.bf16.msra.mxu1 %v3581_v51  ;;  %v3652_v50 = vld [vmem:[#allocation4 + $0x64] ss:$16 sps:$4 sm:$0xff]  }
 0x113   :  { %1278 = vmatprep.subr.bf16.mxu0 %v3586_v52  ;;  %1319 = vmatprep.subr.bf16.mxu1 %v3589_v53  ;;  %v3655_v51 = vld [vmem:[#allocation4 + $0x264] ss:$16 sps:$4 sm:$0xff]   ;;  %v3650_v52 = vld [vmem:[#allocation4 + $0x60] ss:$16 sps:$4 sm:$0xff]  }
 0x114   :  { %v3653_v53 = vld [vmem:[#allocation4 + $0x260] ss:$16 sps:$4 sm:$0xff]  }
 0x116   :  { %1279 = vmatpush2.bf16.msra.mxu0 %v3584_v54  ;;  %1320 = vmatpush2.bf16.msra.mxu1 %v3587_v55  ;;  %v3658_v54 = vld [vmem:[#allocation4 + $0x44] ss:$16 sps:$4 sm:$0xff]  }
 0x117   :  { %1280 = vmatprep.subr.bf16.mxu0 %v3592_v56  ;;  %1321 = vmatprep.subr.bf16.mxu1 %v3595_v57  ;;  %v3661_v55 = vld [vmem:[#allocation4 + $0x244] ss:$16 sps:$4 sm:$0xff]   ;;  %v3656_v56 = vld [vmem:[#allocation4 + $0x40] ss:$16 sps:$4 sm:$0xff]  }
 0x118   :  { %v3659_v57 = vld [vmem:[#allocation4 + $0x240] ss:$16 sps:$4 sm:$0xff]  }
 0x11a   :  { %1281 = vmatpush2.bf16.msra.mxu0 %v3590_v58  ;;  %1322 = vmatpush2.bf16.msra.mxu1 %v3593_v59  ;;  %v3664_v58 = vld [vmem:[#allocation4 + $0x24] ss:$16 sps:$4 sm:$0xff]  }
 0x11b   :  { %1282 = vmatprep.subr.bf16.mxu0 %v3598_v60  ;;  %1323 = vmatprep.subr.bf16.mxu1 %v3601_v61  ;;  %v3667_v59 = vld [vmem:[#allocation4 + $0x224] ss:$16 sps:$4 sm:$0xff]   ;;  %v3662_v60 = vld [vmem:[#allocation4 + $0x20] ss:$16 sps:$4 sm:$0xff]  }
 0x11c   :  { %v3665_v61 = vld [vmem:[#allocation4 + $0x220] ss:$16 sps:$4 sm:$0xff]  }
 0x11e   :  { %1283 = vmatpush2.bf16.msra.mxu0 %v3596_v62  ;;  %1324 = vmatpush2.bf16.msra.mxu1 %v3599_v0  ;;  %v3670_v62 = vld [vmem:[#allocation4 + $0x4] ss:$16 sps:$4 sm:$0xff]  }
 0x11f   :  { %1284 = vmatprep.subr.bf16.mxu0 %v3604_v1  ;;  %1325 = vmatprep.subr.bf16.mxu1 %v3607_v2  ;;  %v3673_v0 = vld [vmem:[#allocation4 + $0x204] ss:$16 sps:$4 sm:$0xff]   ;;  %v3668_v1 = vld [vmem:[#allocation4] ss:$16 sps:$4 sm:$0xff]  }
 0x120   :  { %v3671_v2 = vld [vmem:[#allocation4 + $0x200] ss:$16 sps:$4 sm:$0xff]  }
 0x122   :  { %1285 = vmatpush2.bf16.msra.mxu0 %v3602_v4  ;;  %1326 = vmatpush2.bf16.msra.mxu1 %v3605_v5  ;;  %v3676_v4 = vld [vmem:[#allocation4 + $0x1e4] ss:$16 sps:$4 sm:$0xff]  }
 0x123   :  { %1286 = vmatprep.subr.bf16.mxu0 %v3610_v7  ;;  %1327 = vmatprep.subr.bf16.mxu1 %v3613_v9  ;;  %v3679_v5 = vld [vmem:[#allocation4 + $0x3e4] ss:$16 sps:$4 sm:$0xff]   ;;  %v3674_v7 = vld [vmem:[#allocation4 + $0x1e0] ss:$16 sps:$4 sm:$0xff]  }
 0x124   :  { %v3677_v9 = vld [vmem:[#allocation4 + $0x3e0] ss:$16 sps:$4 sm:$0xff]  }
 0x126   :  { %1287 = vmatpush2.bf16.msra.mxu0 %v3608_v14  ;;  %1328 = vmatpush2.bf16.msra.mxu1 %v3611_v15  ;;  %v3680_v14 = vld [vmem:[#allocation4 + $0x1c0] ss:$16 sps:$4 sm:$0xff]  }
 0x127   :  { %1288 = vmatprep.subr.bf16.mxu0 %v3616_v16  ;;  %1329 = vmatprep.subr.bf16.mxu1 %v3619_v17  ;;  %v3683_v15 = vld [vmem:[#allocation4 + $0x3c0] ss:$16 sps:$4 sm:$0xff]   ;;  %v3688_v16 = vld [vmem:[#allocation4 + $0x1a4] ss:$16 sps:$4 sm:$0xff]  }
 0x128   :  { %v3691_v17 = vld [vmem:[#allocation4 + $0x3a4] ss:$16 sps:$4 sm:$0xff]  }
 0x12a   :  { %1289 = vmatpush2.bf16.msra.mxu0 %v3614_v20  ;;  %1330 = vmatpush2.bf16.msra.mxu1 %v3617_v21  ;;  %v3694_v20 = vld [vmem:[#allocation4 + $0x184] ss:$16 sps:$4 sm:$0xff]  }
 0x12b   :  { %1290 = vmatprep.subr.bf16.mxu0 %v3622_v22  ;;  %1331 = vmatprep.subr.bf16.mxu1 %v3625_v23  ;;  %v3697_v21 = vld [vmem:[#allocation4 + $0x384] ss:$16 sps:$4 sm:$0xff]   ;;  %v3692_v22 = vld [vmem:[#allocation4 + $0x180] ss:$16 sps:$4 sm:$0xff]  }
 0x12c   :  { %v3695_v23 = vld [vmem:[#allocation4 + $0x380] ss:$16 sps:$4 sm:$0xff]  }
 0x12e   :  { %1291 = vmatpush2.bf16.msra.mxu0 %v3620_v26  ;;  %1332 = vmatpush2.bf16.msra.mxu1 %v3623_v27  ;;  %v3698_v26 = vld [vmem:[#allocation4 + $0x160] ss:$16 sps:$4 sm:$0xff]   ;;  %v110_v27 = vsub.s32 6, %v4047_v38 }
 0x12f   :  { %2140 = vmatprep.subr.bf16.mxu0 %v3628_v28  ;;  %2181 = vmatprep.subr.bf16.mxu1 %v3631_v29  ;;  %v3701_v28 = vld [vmem:[#allocation4 + $0x360] ss:$16 sps:$4 sm:$0xff]   ;;  %v102_v29 = vsub.s32 4, %v4047_v38 }
 0x131   :  { %1293 = vmatmul.mubr.bf16.vlgmr.msra.gmra.mxu0 %v4076_v3  ;;  %1334 = vmatmul.mubr.bf16.vlgmr.msra.gmra.mxu1 %v4074_v63  ;;  %v3641_v3 = vld [vmem:[#allocation4 + $0x2a0] ss:$16 sps:$4 sm:$0xff]   ;;  %v3649_v63 = vld [vmem:[#allocation4 + $0x284] ss:$16 sps:$4 sm:$0xff]  }
 0x132   :  { %2141 = vmatpush1.bf16.msra.mxu0 %v3626_v32  ;;  %2182 = vmatpush1.bf16.msra.mxu1 %v3629_v33  ;;  %v111_v32 = vrot.slane %v4055_v40, %v110_v27  ;;  %v3704_v33 = vld [vmem:[#allocation4 + $0x140] ss:$16 sps:$4 sm:$0xff]   ;;  %v3781_v27 = vld [vmem:[#allocation4 + $0x3cc] ss:$16 sps:$4 sm:$0xff]  }
 0x133   :  { %2142 = vmatprep.subr.bf16.mxu0 %v3634_v34  ;;  %2183 = vmatprep.subr.bf16.mxu1 %v3637_v10  ;;  %v103_v34 = vrot.slane %v4055_v40, %v102_v29  ;;  %v3707_v10 = vld [vmem:[#allocation4 + $0x340] ss:$16 sps:$4 sm:$0xff]   ;;  %v3779_v29 = vld [vmem:[#allocation4 + $0x3c8] ss:$16 sps:$4 sm:$0xff]  }
 0x134   :  { %2172 = vmatprep.mubr.bf16.mxu0 %v4094_v35  ;;  %2213 = vmatprep.mubr.bf16.mxu1 %v4097_v12  ;;  %v3716_v40 = vld [vmem:[#allocation4 + $0x100] ss:$16 sps:$4 sm:$0xff]  }
 0x135   :  { %v325_v38 = vadd.f32 %v4078_v6, %v103_v34  ;;  %v3722_v6 = vld [vmem:[#allocation4 + $0xe8] ss:$16 sps:$4 sm:$0xff]   ;;  %v3790_v34 = vld [vmem:[#allocation4 + $0x18c] ss:$16 sps:$4 sm:$0xff]  }
 0x136   :  { %2143 = vmatpush1.bf16.msra.mxu0 %v3632_v36  ;;  %2184 = vmatpush1.bf16.msra.mxu1 %v3635_v37  ;;  %v3712_v36 = vld [vmem:[#allocation4 + $0x124] ss:$16 sps:$4 sm:$0xff]  }
 0x137   :  { %2144 = vmatprep.subr.bf16.mxu0 %v3640_v44  ;;  %2185 = vmatprep.subr.bf16.mxu1 %v3643_v45  ;;  %v3715_v37 = vld [vmem:[#allocation4 + $0x324] ss:$16 sps:$4 sm:$0xff]   ;;  %v366_v44 = vadd.f32 %v4080_v8, %v111_v32  ;;  %v3710_v45 = vld [vmem:[#allocation4 + $0x120] ss:$16 sps:$4 sm:$0xff]   ;;  %v3727_v8 = vld [vmem:[#allocation4 + $0x2ec] ss:$16 sps:$4 sm:$0xff]  }
 0x138   :  { %v3782_v32 = vld [vmem:[#allocation4 + $0x1a8] ss:$16 sps:$4 sm:$0xff]  }
 0x13a   :  { %2145 = vmatpush1.bf16.msra.mxu0 %v3638_v46  ;;  %2186 = vmatpush1.bf16.msra.mxu1 %v3641_v3  ;;  %v3713_v46 = vld [vmem:[#allocation4 + $0x320] ss:$16 sps:$4 sm:$0xff]   ;;  %v3718_v3 = vld [vmem:[#allocation4 + $0x104] ss:$16 sps:$4 sm:$0xff]  }
 0x13b   :  { %2146 = vmatprep.subr.bf16.mxu0 %v3646_v47  ;;  %2187 = vmatprep.subr.bf16.mxu1 %v3649_v63  ;;  %v3721_v47 = vld [vmem:[#allocation4 + $0x304] ss:$16 sps:$4 sm:$0xff]   ;;  %v378_v63 = vmax.f32 %v366_v44, 0.0  ;;  %v3796_v44 = vld [vmem:[#allocation4 + $0x16c] ss:$16 sps:$4 sm:$0xff]  }
 0x13e   :  { %2147 = vmatpush1.bf16.msra.mxu0 %v3644_v48  ;;  %2188 = vmatpush1.bf16.msra.mxu1 %v3647_v49  ;;  %v376_v48 = vmax.f32 %v325_v38, 0.0  ;;  %v3719_v49 = vld [vmem:[#allocation4 + $0x300] ss:$16 sps:$4 sm:$0xff]   ;;  %v3794_v38 = vld [vmem:[#allocation4 + $0x168] ss:$16 sps:$4 sm:$0xff]  }
 0x13f   :  { %2148 = vmatprep.subr.bf16.mxu0 %v3652_v50  ;;  %2189 = vmatprep.subr.bf16.mxu1 %v3655_v51  ;;  %v3724_v50 = vld [vmem:[#allocation4 + $0xec] ss:$16 sps:$4 sm:$0xff]   ;;  %v4108_v51 = vpack.c.bf16 %v378_v63, %v378_v63  ;;  %v3800_v63 = vld [vmem:[#allocation4 + $0x148] ss:$16 sps:$4 sm:$0xff]  }
 0x142   :  { %2149 = vmatpush1.bf16.msra.mxu0 %v3650_v52  ;;  %2190 = vmatpush1.bf16.msra.mxu1 %v3653_v53  ;;  %v4110_v52 = vpack.c.bf16 %v376_v48, %v376_v48  ;;  %v3725_v53 = vld [vmem:[#allocation4 + $0x2e8] ss:$16 sps:$4 sm:$0xff]   ;;  %v3808_v48 = vld [vmem:[#allocation4 + $0x12c] ss:$16 sps:$4 sm:$0xff]  }
 0x143   :  { %2150 = vmatprep.subr.bf16.mxu0 %v3658_v54  ;;  %2191 = vmatprep.subr.bf16.mxu1 %v3661_v55  ;;  %v3730_v54 = vld [vmem:[#allocation4 + $0xcc] ss:$16 sps:$4 sm:$0xff]  }
 0x144   :  { %v3733_v55 = vld [vmem:[#allocation4 + $0x2cc] ss:$16 sps:$4 sm:$0xff]  }
 0x146   :  { %2151 = vmatpush1.bf16.msra.mxu0 %v3656_v56  ;;  %2192 = vmatpush1.bf16.msra.mxu1 %v3659_v57  ;;  %v3728_v56 = vld [vmem:[#allocation4 + $0xc8] ss:$16 sps:$4 sm:$0xff]  }
 0x147   :  { %2152 = vmatprep.subr.bf16.mxu0 %v3664_v58  ;;  %2193 = vmatprep.subr.bf16.mxu1 %v3667_v59  ;;  %v3731_v57 = vld [vmem:[#allocation4 + $0x2c8] ss:$16 sps:$4 sm:$0xff]   ;;  %v3736_v58 = vld [vmem:[#allocation4 + $0xac] ss:$16 sps:$4 sm:$0xff]  }
 0x148   :  { %v3739_v59 = vld [vmem:[#allocation4 + $0x2ac] ss:$16 sps:$4 sm:$0xff]  }
 0x14a   :  { %2153 = vmatpush1.bf16.msra.mxu0 %v3662_v60  ;;  %2194 = vmatpush1.bf16.msra.mxu1 %v3665_v61  ;;  %v3734_v60 = vld [vmem:[#allocation4 + $0xa8] ss:$16 sps:$4 sm:$0xff]  }
 0x14b   :  { %2154 = vmatprep.subr.bf16.mxu0 %v3670_v62  ;;  %2195 = vmatprep.subr.bf16.mxu1 %v3673_v0  ;;  %v3737_v61 = vld [vmem:[#allocation4 + $0x2a8] ss:$16 sps:$4 sm:$0xff]   ;;  %v3742_v62 = vld [vmem:[#allocation4 + $0x8c] ss:$16 sps:$4 sm:$0xff]  }
 0x14c   :  { %v3745_v0 = vld [vmem:[#allocation4 + $0x28c] ss:$16 sps:$4 sm:$0xff]  }
 0x14e   :  { %2155 = vmatpush1.bf16.msra.mxu0 %v3668_v1  ;;  %2196 = vmatpush1.bf16.msra.mxu1 %v3671_v2  ;;  %v3740_v1 = vld [vmem:[#allocation4 + $0x88] ss:$16 sps:$4 sm:$0xff]   ;;  %v3748_v2 = vld [vmem:[#allocation4 + $0x6c] ss:$16 sps:$4 sm:$0xff]  }
 0x14f   :  { %2156 = vmatprep.subr.bf16.mxu0 %v3676_v4  ;;  %2197 = vmatprep.subr.bf16.mxu1 %v3679_v5  ;;  %v3751_v4 = vld [vmem:[#allocation4 + $0x26c] ss:$16 sps:$4 sm:$0xff]   ;;  %v3749_v5 = vld [vmem:[#allocation4 + $0x268] ss:$16 sps:$4 sm:$0xff]  }
 0x152   :  { %2157 = vmatpush2.bf16.msra.mxu0 %v3674_v7  ;;  %2198 = vmatpush2.bf16.msra.mxu1 %v3677_v9  ;;  %v3754_v7 = vld [vmem:[#allocation4 + $0x4c] ss:$16 sps:$4 sm:$0xff]  }
 0x153   :  { %2158 = vmatprep.subr.bf16.mxu0 %v3682_v11  ;;  %2199 = vmatprep.subr.bf16.mxu1 %v3685_v13  ;;  %v3757_v9 = vld [vmem:[#allocation4 + $0x24c] ss:$16 sps:$4 sm:$0xff]   ;;  %v3752_v11 = vld [vmem:[#allocation4 + $0x48] ss:$16 sps:$4 sm:$0xff]  }
 0x154   :  { %v3755_v13 = vld [vmem:[#allocation4 + $0x248] ss:$16 sps:$4 sm:$0xff]  }
 0x156   :  { %2159 = vmatpush2.bf16.msra.mxu0 %v3680_v14  ;;  %2200 = vmatpush2.bf16.msra.mxu1 %v3683_v15  ;;  %v3760_v14 = vld [vmem:[#allocation4 + $0x2c] ss:$16 sps:$4 sm:$0xff]  }
 0x157   :  { %2160 = vmatprep.subr.bf16.mxu0 %v3688_v16  ;;  %2201 = vmatprep.subr.bf16.mxu1 %v3691_v17  ;;  %v3763_v15 = vld [vmem:[#allocation4 + $0x22c] ss:$16 sps:$4 sm:$0xff]   ;;  %v3758_v16 = vld [vmem:[#allocation4 + $0x28] ss:$16 sps:$4 sm:$0xff]  }
 0x158   :  { %v3761_v17 = vld [vmem:[#allocation4 + $0x228] ss:$16 sps:$4 sm:$0xff]  }
 0x15a   :  { %2161 = vmatpush2.bf16.msra.mxu0 %v3686_v18  ;;  %2202 = vmatpush2.bf16.msra.mxu1 %v3689_v19  ;;  %v3766_v18 = vld [vmem:[#allocation4 + $0xc] ss:$16 sps:$4 sm:$0xff]  }
 0x15b   :  { %2162 = vmatprep.subr.bf16.mxu0 %v3694_v20  ;;  %2203 = vmatprep.subr.bf16.mxu1 %v3697_v21  ;;  %v3769_v19 = vld [vmem:[#allocation4 + $0x20c] ss:$16 sps:$4 sm:$0xff]   ;;  %v3764_v20 = vld [vmem:[#allocation4 + $0x8] ss:$16 sps:$4 sm:$0xff]  }
 0x15c   :  { %v3767_v21 = vld [vmem:[#allocation4 + $0x208] ss:$16 sps:$4 sm:$0xff]  }
 0x15e   :  { %2163 = vmatpush2.bf16.msra.mxu0 %v3692_v22  ;;  %2204 = vmatpush2.bf16.msra.mxu1 %v3695_v23  ;;  %v3772_v22 = vld [vmem:[#allocation4 + $0x1ec] ss:$16 sps:$4 sm:$0xff]  }
 0x15f   :  { %2164 = vmatprep.subr.bf16.mxu0 %v3700_v24  ;;  %2205 = vmatprep.subr.bf16.mxu1 %v3703_v25  ;;  %v3775_v23 = vld [vmem:[#allocation4 + $0x3ec] ss:$16 sps:$4 sm:$0xff]   ;;  %v3770_v24 = vld [vmem:[#allocation4 + $0x1e8] ss:$16 sps:$4 sm:$0xff]  }
 0x160   :  { %v3773_v25 = vld [vmem:[#allocation4 + $0x3e8] ss:$16 sps:$4 sm:$0xff]  }
 0x162   :  { %2165 = vmatpush2.bf16.msra.mxu0 %v3698_v26  ;;  %2206 = vmatpush2.bf16.msra.mxu1 %v3701_v28  ;;  %v3778_v26 = vld [vmem:[#allocation4 + $0x1cc] ss:$16 sps:$4 sm:$0xff]   ;;  %v3776_v28 = vld [vmem:[#allocation4 + $0x1c8] ss:$16 sps:$4 sm:$0xff]  }
 0x163   :  { %2166 = vmatprep.subr.bf16.mxu0 %v3706_v30  ;;  %2207 = vmatprep.subr.bf16.mxu1 %v3709_v31  ;;  %v3784_v30 = vld [vmem:[#allocation4 + $0x1ac] ss:$16 sps:$4 sm:$0xff]  }
 0x164   :  { %v3787_v31 = vld [vmem:[#allocation4 + $0x3ac] ss:$16 sps:$4 sm:$0xff]  }
 0x166   :  { %2167 = vmatpush2.bf16.msra.mxu0 %v3704_v33  ;;  %2208 = vmatpush2.bf16.msra.mxu1 %v3707_v10  ;;  %v3785_v33 = vld [vmem:[#allocation4 + $0x3a8] ss:$16 sps:$4 sm:$0xff]   ;;  %v3793_v10 = vld [vmem:[#allocation4 + $0x38c] ss:$16 sps:$4 sm:$0xff]  }
 0x167   :  { %2168 = vmatprep.subr.bf16.mxu0 %v3712_v36  ;;  %2209 = vmatprep.subr.bf16.mxu1 %v3715_v37  ;;  %v3788_v36 = vld [vmem:[#allocation4 + $0x188] ss:$16 sps:$4 sm:$0xff]  }
 0x168   :  { %v3791_v37 = vld [vmem:[#allocation4 + $0x388] ss:$16 sps:$4 sm:$0xff]  }
 0x16a   :  { %2169 = vmatpush2.bf16.msra.mxu0 %v3710_v45  ;;  %2210 = vmatpush2.bf16.msra.mxu1 %v3713_v46  ;;  %v3799_v45 = vld [vmem:[#allocation4 + $0x36c] ss:$16 sps:$4 sm:$0xff]   ;;  %v3797_v46 = vld [vmem:[#allocation4 + $0x368] ss:$16 sps:$4 sm:$0xff]  }
 0x16b   :  { %2170 = vmatprep.subr.bf16.mxu0 %v3718_v3  ;;  %2211 = vmatprep.subr.bf16.mxu1 %v3721_v47  ;;  %v3802_v3 = vld [vmem:[#allocation4 + $0x14c] ss:$16 sps:$4 sm:$0xff]  }
 0x16c   :  { %v3805_v47 = vld [vmem:[#allocation4 + $0x34c] ss:$16 sps:$4 sm:$0xff]  }
 0x16e   :  { %2171 = vmatpush2.bf16.msra.mxu0 %v3716_v40  ;;  %2212 = vmatpush2.bf16.msra.mxu1 %v3719_v49  ;;  %v3803_v40 = vld [vmem:[#allocation4 + $0x348] ss:$16 sps:$4 sm:$0xff]   ;;  %v3811_v49 = vld [vmem:[#allocation4 + $0x32c] ss:$16 sps:$4 sm:$0xff]  }
 0x16f   :  { %2222 = vmatprep.subr.bf16.mxu0 %v3724_v50  ;;  %2263 = vmatprep.subr.bf16.mxu1 %v3727_v8  ;;  %v3806_v50 = vld [vmem:[#allocation4 + $0x128] ss:$16 sps:$4 sm:$0xff]  }
 0x170   :  { %v3809_v8 = vld [vmem:[#allocation4 + $0x328] ss:$16 sps:$4 sm:$0xff]  }
 0x171   :  { %2173 = vmatmul.mubr.bf16.vlgmr.msra.gmra.mxu0 %v4110_v52  ;;  %2214 = vmatmul.mubr.bf16.vlgmr.msra.gmra.mxu1 %v4108_v51 }
 0x172   :  { %2223 = vmatpush1.bf16.msra.mxu0 %v3722_v6  ;;  %2254 = vmatprep.mubr.bf16.mxu0 %v4094_v35  ;;  %v3743_v35 = vld [vmem:[#allocation4 + $0x288] ss:$16 sps:$4 sm:$0xff]   ;;  %v3814_v6 = vld [vmem:[#allocation4 + $0x10c] ss:$16 sps:$4 sm:$0xff]  }
 0x173   :  { %2264 = vmatpush1.bf16.msra.mxu1 %v3725_v53  ;;  %2295 = vmatprep.mubr.bf16.mxu1 %v4097_v12  ;;  %v3746_v12 = vld [vmem:[#allocation4 + $0x68] ss:$16 sps:$4 sm:$0xff]   ;;  %v3817_v53 = vld [vmem:[#allocation4 + $0x30c] ss:$16 sps:$4 sm:$0xff]  }
 0x174   :  { %2224 = vmatprep.subr.bf16.mxu0 %v3730_v54  ;;  %2265 = vmatprep.subr.bf16.mxu1 %v3733_v55  ;;  %v3812_v54 = vld [vmem:[#allocation4 + $0x108] ss:$16 sps:$4 sm:$0xff]  }
 0x175   :  { %v3815_v55 = vld [vmem:[#allocation4 + $0x308] ss:$16 sps:$4 sm:$0xff]  }
 0x176   :  { %2225 = vmatpush1.bf16.msra.mxu0 %v3728_v56  ;;  %v4119_v56 = vld [vmem:[%s4358_s4] sm:$0xf] }
 0x177   :  { %2266 = vmatpush1.bf16.msra.mxu1 %v3731_v57  ;;  %2226 = vmatprep.subr.bf16.mxu0 %v3736_v58  ;;  %v3818_v57 = vld [vmem:[%s4362_s8 + $0x78] sm:$0xff]   ;;  %v521_v58 = vrot.slane %v4119_v56, %v4050_v39 }
 0x178   :  { %2267 = vmatprep.subr.bf16.mxu1 %v3739_v59  ;;  %v3819_v59 = vld [vmem:[%s4362_s8 + $0x38] sm:$0xff]  }
 0x17a   :  { %2227 = vmatpush1.bf16.msra.mxu0 %v3734_v60  ;;  %v3820_v60 = vld [vmem:[%s4362_s8 + $0x70] sm:$0xff]  }
 0x17b   :  { %2268 = vmatpush1.bf16.msra.mxu1 %v3737_v61  ;;  %2228 = vmatprep.subr.bf16.mxu0 %v3742_v62  ;;  %v525_v61 = vrot.slane %v4119_v56, %v4061_v42 }
 0x17c   :  { %2269 = vmatprep.subr.bf16.mxu1 %v3745_v0 }
 0x17e   :  { %2229 = vmatpush1.bf16.msra.mxu0 %v3740_v1 }
 0x17f   :  { %2270 = vmatpush1.bf16.msra.mxu1 %v3743_v35  ;;  %2230 = vmatprep.subr.bf16.mxu0 %v3748_v2  ;;  %v3821_v35 = vld [vmem:[%s4362_s8 + $0x30] sm:$0xff]  }
 0x180   :  { %2271 = vmatprep.subr.bf16.mxu1 %v3751_v4  ;;  %v3822_v4 = vld [vmem:[%s4362_s8 + $0x68] sm:$0xff]  }
 0x182   :  { %2231 = vmatpush1.bf16.msra.mxu0 %v3746_v12 }
 0x183   :  { %2272 = vmatpush1.bf16.msra.mxu1 %v3749_v5  ;;  %2232 = vmatprep.subr.bf16.mxu0 %v3754_v7 }
 0x184   :  { %2273 = vmatprep.subr.bf16.mxu1 %v3757_v9 }
 0x186   :  { %2233 = vmatpush1.bf16.msra.mxu0 %v3752_v11  ;;  %v3823_v11 = vld [vmem:[%s4362_s8 + $0x28] sm:$0xff]  }
 0x187   :  { %2274 = vmatpush1.bf16.msra.mxu1 %v3755_v13  ;;  %2234 = vmatprep.subr.bf16.mxu0 %v3760_v14  ;;  %v3824_v14 = vld [vmem:[%s4362_s8 + $0x60] sm:$0xff]  }
 0x188   :  { %2275 = vmatprep.subr.bf16.mxu1 %v3763_v15 }
 0x18a   :  { %2235 = vmatpush1.bf16.msra.mxu0 %v3758_v16  ;;  %v3825_v16 = vld [vmem:[%s4362_s8 + $0x20] sm:$0xff]  }
 0x18b   :  { %2276 = vmatpush1.bf16.msra.mxu1 %v3761_v17  ;;  %2236 = vmatprep.subr.bf16.mxu0 %v3766_v18  ;;  %v3826_v17 = vld [vmem:[%s4362_s8 + $0x58] sm:$0xff]  }
 0x18c   :  { %2277 = vmatprep.subr.bf16.mxu1 %v3769_v19  ;;  %v3827_v18 = vld [vmem:[%s4362_s8 + $0x18] sm:$0xff]   ;;  %v3828_v19 = vld [vmem:[%s4362_s8 + $0x50] sm:$0xff]  }
 0x18e   :  { %2237 = vmatpush1.bf16.msra.mxu0 %v3764_v20  ;;  %v3829_v20 = vld [vmem:[%s4362_s8 + $0x10] sm:$0xff]  }
 0x18f   :  { %2278 = vmatpush1.bf16.msra.mxu1 %v3767_v21  ;;  %2238 = vmatprep.subr.bf16.mxu0 %v3772_v22  ;;  %v3830_v21 = vld [vmem:[%s4362_s8 + $0x48] sm:$0xff]  }
 0x190   :  { %2279 = vmatprep.subr.bf16.mxu1 %v3775_v23  ;;  %v3831_v22 = vld [vmem:[%s4362_s8 + $0x8] sm:$0xff]   ;;  %v3832_v23 = vld [vmem:[%s4362_s8 + $0x40] sm:$0xff]  }
 0x192   :  { %2239 = vmatpush2.bf16.msra.mxu0 %v3770_v24  ;;  %v3833_v24 = vld [vmem:[%s4362_s8] sm:$0xff]  }
 0x193   :  { %2280 = vmatpush2.bf16.msra.mxu1 %v3773_v25  ;;  %2240 = vmatprep.subr.bf16.mxu0 %v3778_v26  ;;  %v3834_v25 = vld [vmem:[%s4361_s7 + $0x78] sm:$0xff]  }
 0x194   :  { %2281 = vmatprep.subr.bf16.mxu1 %v3781_v27  ;;  %v3850_v26 = vld [vmem:[%s4362_s8 + $0xf8] sm:$0xff]  }
 0x195   :  { %v3851_v27 = vld [vmem:[%s4362_s8 + $0xb8] sm:$0xff]  }
 0x196   :  { %2241 = vmatpush2.bf16.msra.mxu0 %v3776_v28  ;;  %v3852_v28 = vld [vmem:[%s4362_s8 + $0xf0] sm:$0xff]  }
 0x197   :  { %2282 = vmatpush2.bf16.msra.mxu1 %v3779_v29  ;;  %2242 = vmatprep.subr.bf16.mxu0 %v3784_v30  ;;  %v3853_v29 = vld [vmem:[%s4362_s8 + $0xb0] sm:$0xff]   ;;  %v3854_v30 = vld [vmem:[%s4362_s8 + $0xe8] sm:$0xff]  }
 0x198   :  { %2283 = vmatprep.subr.bf16.mxu1 %v3787_v31  ;;  %v3855_v31 = vld [vmem:[%s4362_s8 + $0xa8] sm:$0xff]  }
 0x19a   :  { %2243 = vmatpush2.bf16.msra.mxu0 %v3782_v32  ;;  %v3856_v32 = vld [vmem:[%s4362_s8 + $0xe0] sm:$0xff]  }
 0x19b   :  { %2284 = vmatpush2.bf16.msra.mxu1 %v3785_v33  ;;  %2244 = vmatprep.subr.bf16.mxu0 %v3790_v34  ;;  %v3857_v33 = vld [vmem:[%s4362_s8 + $0xa0] sm:$0xff]   ;;  %v3858_v34 = vld [vmem:[%s4362_s8 + $0xd8] sm:$0xff]  }
 0x19c   :  { %2285 = vmatprep.subr.bf16.mxu1 %v3793_v10  ;;  %v3859_v10 = vld [vmem:[%s4362_s8 + $0x98] sm:$0xff]  }
 0x19e   :  { %2245 = vmatpush2.bf16.msra.mxu0 %v3788_v36  ;;  %v3860_v36 = vld [vmem:[%s4362_s8 + $0xd0] sm:$0xff]  }
 0x19f   :  { %2286 = vmatpush2.bf16.msra.mxu1 %v3791_v37  ;;  %2246 = vmatprep.subr.bf16.mxu0 %v3796_v44  ;;  %v529_v37 = vrot.slane %v4119_v56, %v4058_v41  ;;  %v533_v44 = vrot.slane %v4119_v56, %v4064_v43  ;;  %v3864_v56 = vld [vmem:[%s4362_s8 + $0xc0] sm:$0xff]  }
 0x1a0   :  { %2287 = vmatprep.subr.bf16.mxu1 %v3799_v45 }
 0x1a2   :  { %2247 = vmatpush2.bf16.msra.mxu0 %v3794_v38  ;;  %v3861_v38 = vld [vmem:[%s4362_s8 + $0x90] sm:$0xff]  }
 0x1a3   :  { %2288 = vmatpush2.bf16.msra.mxu1 %v3797_v46  ;;  %2248 = vmatprep.subr.bf16.mxu0 %v3802_v3 }
 0x1a4   :  { %2289 = vmatprep.subr.bf16.mxu1 %v3805_v47 }
 0x1a6   :  { %2249 = vmatpush2.bf16.msra.mxu0 %v3800_v63 }
 0x1a7   :  { %2290 = vmatpush2.bf16.msra.mxu1 %v3803_v40  ;;  %2250 = vmatprep.subr.bf16.mxu0 %v3808_v48 }
 0x1a8   :  { %2291 = vmatprep.subr.bf16.mxu1 %v3811_v49  ;;  %v3862_v49 = vld [vmem:[%s4362_s8 + $0xc8] sm:$0xff]  }
 0x1aa   :  { %2251 = vmatpush2.bf16.msra.mxu0 %v3806_v50 }
 0x1ab   :  { %2292 = vmatpush2.bf16.msra.mxu1 %v3809_v8  ;;  %2252 = vmatprep.subr.bf16.mxu0 %v3814_v6  ;;  %v3863_v8 = vld [vmem:[%s4362_s8 + $0x88] sm:$0xff]  }
 0x1ac   :  { %2293 = vmatprep.subr.bf16.mxu1 %v3817_v53 }
 0x1ae   :  { %2253 = vmatpush2.bf16.msra.mxu0 %v3812_v54 }
 0x1af   :  { %2294 = vmatpush2.bf16.msra.mxu1 %v3815_v55  ;;  %3341 = vmatprep.subr.bf16.mxu0 %v3818_v57  ;;  %v3865_v57 = vld [vmem:[%s4362_s8 + $0x80] sm:$0xff]  }
 0x1b0   :  { %3363 = vmatprep.subr.bf16.mxu1 %v3850_v26  ;;  %v3844_v26 = vld [vmem:[%s4361_s7 + $0x50] sm:$0xff]  }
 0x1b1   :  { %2255 = vmatmul.mubr.bf16.vlgmr.msra.gmra.mxu0 %v4110_v52  ;;  %v1212_v62 = vpop.f32.mrf.mxu0  ;;  %v1253_v1 = vpop.f32.mrf.mxu1 }
 0x1b2   :  { %2296 = vmatmul.mubr.bf16.vlgmr.msra.gmra.mxu1 %v4108_v51  ;;  %v1213_v0 = vadd.f32 %v1212_v62, %v521_v58  ;;  %3342 = vmatpush3.bf16.msra.mxu0 %v3819_v59  ;;  %v3866_v58 = vld [vmem:[%s4361_s7 + $0xf8] sm:$0xff]   ;;  %v4244_v59 = vld [vmem:[%s4360_s6] sm:$0xf] }
 0x1b3   :  { %v1214_v2 = vpop.f32.mrf.mxu0  ;;  %3343 = vmatprep.subr.bf16.mxu0 %v3820_v60  ;;  %v1255_v52 = vpop.f32.mrf.mxu1  ;;  %3364 = vmatpush3.bf16.msra.mxu1 %v3851_v27  ;;  %v1483_v60 = vrot.slane %v4244_v59, %v4050_v39  ;;  %v3845_v27 = vld [vmem:[%s4361_s7 + $0x10] sm:$0xff]  }
 0x1b4   :  { %v4142_v12 = vadd.f32 %v1253_v1, %v1213_v0  ;;  %v1215_v5 = vadd.f32 %v1214_v2, %v525_v61  ;;  %3365 = vmatprep.subr.bf16.mxu1 %v3852_v28  ;;  %v1487_v61 = vrot.slane %v4244_v59, %v4061_v42  ;;  %v3835_v42 = vld [vmem:[%s4361_s7 + $0x38] sm:$0xff]   ;;  %v3846_v28 = vld [vmem:[%s4361_s7 + $0x48] sm:$0xff]  }
 0x1b5   :  { %v1216_v7 = vpop.f32.mrf.mxu0  ;;  %v1257_v51 = vpop.f32.mrf.mxu1 }
 0x1b6   :  { %v4144_v9 = vadd.f32 %v1255_v52, %v1215_v5  ;;  %3344 = vmatpush3.bf16.msra.mxu0 %v3821_v35 }
 0x1b7   :  { %v1217_v13 = vpop.f32.mrf.mxu0  ;;  %3345 = vmatprep.subr.bf16.mxu0 %v3822_v4  ;;  %v1258_v15 = vpop.f32.mrf.mxu1  ;;  %3366 = vmatpush3.bf16.msra.mxu1 %v3853_v29  ;;  %v3847_v29 = vld [vmem:[%s4361_s7 + $0x8] sm:$0xff]  }
 0x1b8   :  { %3367 = vmatprep.subr.bf16.mxu1 %v3854_v30  ;;  %v3848_v30 = vld [vmem:[%s4361_s7 + $0x40] sm:$0xff]  }
 0x1ba   :  { %3346 = vmatpush3.bf16.msra.mxu0 %v3823_v11 }
 0x1bb   :  { %3347 = vmatprep.subr.bf16.mxu0 %v3824_v14  ;;  %3368 = vmatpush3.bf16.msra.mxu1 %v3855_v31  ;;  %v1343_v14 = vmax.f32 %v4144_v9, 0.0  ;;  %v3837_v9 = vld [vmem:[%s4361_s7 + $0x30] sm:$0xff]   ;;  %v3849_v31 = vld [vmem:[%s4361_s7] sm:$0xff]  }
 0x1bc   :  { %3369 = vmatprep.subr.bf16.mxu1 %v3856_v32  ;;  %v1342_v32 = vmax.f32 %v4142_v12, 0.0 }
 0x1be   :  { %3348 = vmatpush3.bf16.msra.mxu0 %v3825_v16 }
 0x1bf   :  { %3349 = vmatprep.subr.bf16.mxu0 %v3826_v17  ;;  %3370 = vmatpush3.bf16.msra.mxu1 %v3857_v33  ;;  %v1346_v33 = vpack.c.bf16 %v1342_v32, %v1342_v32 }
 0x1c0   :  { %3371 = vmatprep.subr.bf16.mxu1 %v3858_v34  ;;  %v1491_v34 = vrot.slane %v4244_v59, %v4058_v41 }
 0x1c2   :  { %3350 = vmatpush3.bf16.msra.mxu0 %v3827_v18  ;;  %v3836_v18 = vld [vmem:[%s4361_s7 + $0x70] sm:$0xff]  }
 0x1c3   :  { %3351 = vmatprep.subr.bf16.mxu0 %v3828_v19  ;;  %3372 = vmatpush3.bf16.msra.mxu1 %v3859_v10  ;;  %v1347_v19 = vpack.c.bf16 %v1343_v14, %v1343_v14  ;;  %v1495_v10 = vrot.slane %v4244_v59, %v4064_v43  ;;  %v3867_v43 = vld [vmem:[%s4361_s7 + $0xb8] sm:$0xff]   ;;  %v3872_v59 = vld [vmem:[%s4361_s7 + $0xe0] sm:$0xff]  }
 0x1c4   :  { %3373 = vmatprep.subr.bf16.mxu1 %v3860_v36 }
 0x1c6   :  { %3352 = vmatpush3.bf16.msra.mxu0 %v3829_v20  ;;  %v3838_v20 = vld [vmem:[%s4361_s7 + $0x68] sm:$0xff]  }
 0x1c7   :  { %3353 = vmatprep.subr.bf16.mxu0 %v3830_v21  ;;  %3374 = vmatpush3.bf16.msra.mxu1 %v3861_v38  ;;  %v3839_v21 = vld [vmem:[%s4361_s7 + $0x28] sm:$0xff]  }
 0x1c8   :  { %3375 = vmatprep.subr.bf16.mxu1 %v3862_v49 }
 0x1ca   :  { %3354 = vmatpush3.bf16.msra.mxu0 %v3831_v22  ;;  %v3840_v22 = vld [vmem:[%s4361_s7 + $0x60] sm:$0xff]  }
 0x1cb   :  { %3355 = vmatprep.subr.bf16.mxu0 %v3832_v23  ;;  %3376 = vmatpush3.bf16.msra.mxu1 %v3863_v8  ;;  %v3841_v23 = vld [vmem:[%s4361_s7 + $0x20] sm:$0xff]  }
 0x1cc   :  { %3377 = vmatprep.subr.bf16.mxu1 %v3864_v56 }
 0x1ce   :  { %3356 = vmatpush3.bf16.msra.mxu0 %v3833_v24  ;;  %v3842_v24 = vld [vmem:[%s4361_s7 + $0x58] sm:$0xff]  }
 0x1cf   :  { %3385 = vmatprep.subr.bf16.mxu0 %v3834_v25  ;;  %3378 = vmatpush3.bf16.msra.mxu1 %v3865_v57  ;;  %v3843_v25 = vld [vmem:[%s4361_s7 + $0x18] sm:$0xff]   ;;  %v3870_v57 = vld [vmem:[%s4361_s7 + $0xe8] sm:$0xff]  }
 0x1d0   :  { %3407 = vmatprep.subr.bf16.mxu1 %v3866_v58  ;;  %v3871_v58 = vld [vmem:[%s4361_s7 + $0xa8] sm:$0xff]  }
 0x1f1   :  { %v1294_v45 = vpop.f32.mrf.mxu0  ;;  %v1335_v3 = vpop.f32.mrf.mxu1 }
 0x1f2   :  { %v1295_v46 = vadd.f32 %v1294_v45, %v529_v37 }
 0x1f3   :  { %v1296_v47 = vpop.f32.mrf.mxu0  ;;  %v1337_v48 = vpop.f32.mrf.mxu1 }
 0x1f4   :  { %v4222_v63 = vadd.f32 %v1335_v3, %v1295_v46  ;;  %v1297_v40 = vadd.f32 %v1296_v47, %v533_v44 }
 0x1f5   :  { %v1298_v50 = vpop.f32.mrf.mxu0  ;;  %v1339_v53 = vpop.f32.mrf.mxu1 }
 0x1f6   :  { %v4230_v6 = vadd.f32 %v1337_v48, %v1297_v40 }
 0x1f7   :  { %v1299_v54 = vpop.f32.mrf.mxu0  ;;  %v1340_v55 = vpop.f32.mrf.mxu1 }
 0x1f8   :  { %v1345_v50 = vmax.f32 %v4230_v6, 0.0  ;;  %v3868_v55 = vld [vmem:[%s4361_s7 + $0xf0] sm:$0xff]  }
 0x1f9   :  { %v3869_v6 = vld [vmem:[%s4361_s7 + $0xb0] sm:$0xff]  }
 0x1fa   :  { %v1349_v56 = vpack.c.bf16 %v1345_v50, %v1345_v50 }
 0x231   :  { %v2174_v62 = vpop.f32.mrf.mxu0  ;;  %v2215_v1 = vpop.f32.mrf.mxu1 }
 0x232   :  { %v2175_v0 = vadd.f32 %v2174_v62, %v1483_v60  ;;  %v3873_v60 = vld [vmem:[%s4361_s7 + $0xa0] sm:$0xff]   ;;  %v3875_v62 = vld [vmem:[%s4361_s7 + $0x98] sm:$0xff]  }
 0x233   :  { %v2176_v35 = vpop.f32.mrf.mxu0  ;;  %v2217_v5 = vpop.f32.mrf.mxu1 }
 0x234   :  { %v2216_v2 = vadd.f32 %v2215_v1, %v2175_v0  ;;  %v2177_v4 = vadd.f32 %v2176_v35, %v1487_v61  ;;  %v3874_v61 = vld [vmem:[%s4361_s7 + $0xd8] sm:$0xff]   ;;  %v3876_v0 = vld [vmem:[%s4361_s7 + $0xd0] sm:$0xff]   ;;  %v3878_v35 = vld [vmem:[%s4361_s7 + $0xc8] sm:$0xff]  }
 0x235   :  { %v2178_v52 = vpop.f32.mrf.mxu0  ;;  %v2219_v51 = vpop.f32.mrf.mxu1  ;;  %v3877_v1 = vld [vmem:[%s4361_s7 + $0x90] sm:$0xff]  }
 0x236   :  { %v2218_v7 = vadd.f32 %v2217_v5, %v2177_v4  ;;  %v2304_v11 = vmax.f32 %v2216_v2, 0.0  ;;  %v3879_v2 = vld [vmem:[%s4361_s7 + $0x88] sm:$0xff]   ;;  %v3880_v4 = vld [vmem:[%s4361_s7 + $0xc0] sm:$0xff]   ;;  %v1344_v52 = vmax.f32 %v4222_v63, 0.0 }
 0x237   :  { %v2179_v13 = vpop.f32.mrf.mxu0  ;;  %v2220_v16 = vpop.f32.mrf.mxu1  ;;  %v3881_v5 = vld [vmem:[%s4361_s7 + $0x80] sm:$0xff]  }
 0x238   :  { %v2305_v15 = vmax.f32 %v2218_v7, 0.0  ;;  %v2308_v17 = vpack.c.bf16 %v2304_v11, %v2304_v11  ;;  %v1348_v7 = vpack.c.bf16 %v1344_v52, %v1344_v52 }
 0x23a   :  { %v2309_v39 = vpack.c.bf16 %v2305_v15, %v2305_v15 }
 0x23c   :  { %2664 = vmatprep.mubr.bf16.mxu0 %v2309_v39 }
 0x23d   :  { %2665 = vmatmul.mubr.bf16.vlgmr.msra.gmra.mxu0 %v2308_v17 }
 0x23e   :  { %3386 = vmatpush3.bf16.msra.mxu0 %v3835_v42  ;;  %2936 = vmatprep.mubr.bf16.mxu0 %v1347_v19 }
 0x23f   :  { %3387 = vmatprep.subr.bf16.mxu0 %v3836_v18 }
 0x242   :  { %3388 = vmatpush3.bf16.msra.mxu0 %v3837_v9 }
 0x243   :  { %3389 = vmatprep.subr.bf16.mxu0 %v3838_v20 }
 0x246   :  { %3390 = vmatpush3.bf16.msra.mxu0 %v3839_v21 }
 0x247   :  { %3391 = vmatprep.subr.bf16.mxu0 %v3840_v22 }
 0x24a   :  { %3392 = vmatpush3.bf16.msra.mxu0 %v3841_v23 }
 0x24b   :  { %3393 = vmatprep.subr.bf16.mxu0 %v3842_v24 }
 0x24e   :  { %3394 = vmatpush3.bf16.msra.mxu0 %v3843_v25 }
 0x24f   :  { %3395 = vmatprep.subr.bf16.mxu0 %v3844_v26 }
 0x252   :  { %3396 = vmatpush3.bf16.msra.mxu0 %v3845_v27  ;;  %v3340_v27 = vld [vmem:[%s4363_s9] ss:$0 sm:$0xff] }
 0x253   :  { %3397 = vmatprep.subr.bf16.mxu0 %v3846_v28 }
 0x256   :  { %3398 = vmatpush3.bf16.msra.mxu0 %v3847_v29 }
 0x257   :  { %3399 = vmatprep.subr.bf16.mxu0 %v3848_v30 }
 0x25a   :  { %3400 = vmatpush3.bf16.msra.mxu0 %v3849_v31 }
 0x25d   :  { %2937 = vmatmul.mubr.bf16.vlgmr.msra.gmra.mxu0 %v1346_v33 }
 0x271   :  { %v2256_v36 = vpop.f32.mrf.mxu0 }
 0x272   :  { %v2257_v37 = vadd.f32 %v2256_v36, %v1491_v34  ;;  %v2297_v44 = vpop.f32.mrf.mxu1 }
 0x273   :  { %v2258_v45 = vpop.f32.mrf.mxu0 }
 0x274   :  { %v2298_v38 = vadd.f32 %v2297_v44, %v2257_v37  ;;  %v2259_v46 = vadd.f32 %v2258_v45, %v1495_v10  ;;  %v2299_v3 = vpop.f32.mrf.mxu1 }
 0x275   :  { %v2260_v47 = vpop.f32.mrf.mxu0 }
 0x276   :  { %v2300_v40 = vadd.f32 %v2299_v3, %v2259_v46  ;;  %v2301_v12 = vpop.f32.mrf.mxu1  ;;  %v2306_v48 = vmax.f32 %v2298_v38, 0.0 }
 0x277   :  { %v2261_v49 = vpop.f32.mrf.mxu0 }
 0x278   :  { %v2307_v8 = vmax.f32 %v2300_v40, 0.0  ;;  %v2302_v53 = vpop.f32.mrf.mxu1  ;;  %v2310_v54 = vpack.c.bf16 %v2306_v48, %v2306_v48 }
 0x27a   :  { %v2311_v41 = vpack.c.bf16 %v2307_v8, %v2307_v8 }
 0x27c   :  { %2704 = vmatprep.mubr.bf16.mxu1 %v2311_v41 }
 0x27d   :  { %2705 = vmatmul.mubr.bf16.vlgmr.msra.gmra.mxu1 %v2310_v54 }
 0x27e   :  { %3408 = vmatpush3.bf16.msra.mxu1 %v3867_v43  ;;  %2976 = vmatprep.mubr.bf16.mxu1 %v1349_v56 }
 0x27f   :  { %3409 = vmatprep.subr.bf16.mxu1 %v3868_v55 }
 0x282   :  { %3410 = vmatpush3.bf16.msra.mxu1 %v3869_v6 }
 0x283   :  { %3411 = vmatprep.subr.bf16.mxu1 %v3870_v57 }
 0x286   :  { %3412 = vmatpush3.bf16.msra.mxu1 %v3871_v58 }
 0x287   :  { %3413 = vmatprep.subr.bf16.mxu1 %v3872_v59 }
 0x28a   :  { %3414 = vmatpush3.bf16.msra.mxu1 %v3873_v60 }
 0x28b   :  { %3415 = vmatprep.subr.bf16.mxu1 %v3874_v61 }
 0x28e   :  { %3416 = vmatpush3.bf16.msra.mxu1 %v3875_v62 }
 0x28f   :  { %3417 = vmatprep.subr.bf16.mxu1 %v3876_v0 }
 0x292   :  { %3418 = vmatpush3.bf16.msra.mxu1 %v3877_v1 }
 0x293   :  { %3419 = vmatprep.subr.bf16.mxu1 %v3878_v35 }
 0x296   :  { %3420 = vmatpush3.bf16.msra.mxu1 %v3879_v2 }
 0x297   :  { %3421 = vmatprep.subr.bf16.mxu1 %v3880_v4 }
 0x29a   :  { %3422 = vmatpush3.bf16.msra.mxu1 %v3881_v5 }
 0x29d   :  { %2977 = vmatmul.mubr.bf16.vlgmr.msra.gmra.mxu1 %v1348_v7 }
 0x2fd   :  { %v3357_v51 = vpop.f32.mrf.mxu0 }
 0x2ff   :  { %v3358_v11 = vpop.f32.mrf.mxu0 }
 0x300   :  { %v3359_v13 = vadd.f32 %v3358_v11, %v3357_v51 }
 0x301   :  { %v3360_v14 = vpop.f32.mrf.mxu0 }
 0x303   :  { %v3361_v15 = vpop.f32.mrf.mxu0 }
 0x31d   :  { %v3401_v16 = vpop.f32.mrf.mxu0 }
 0x31f   :  { %v3402_v39 = vpop.f32.mrf.mxu0 }
 0x320   :  { %v3403_v21 = vadd.f32 %v3402_v39, %v3401_v16 }
 0x321   :  { %v3404_v42 = vpop.f32.mrf.mxu0 }
 0x323   :  { %v3405_v17 = vpop.f32.mrf.mxu0 }
 0x33d   :  { %v3379_v18 = vpop.f32.mrf.mxu1 }
 0x33f   :  { %v3380_v19 = vpop.f32.mrf.mxu1 }
 0x340   :  { %v3381_v9 = vadd.f32 %v3380_v19, %v3379_v18 }
 0x341   :  { %v3382_v20 = vpop.f32.mrf.mxu1 }
 0x342   :  { %v2707_v22 = vadd.f32 %v3381_v9, %v3359_v13 }
 0x343   :  { %v3383_v63 = vpop.f32.mrf.mxu1 }
 0x344   :  { %v2939_v23 = vadd.f32 %v3403_v21, %v2707_v22 }
 0x35d   :  { %v3423_v24 = vpop.f32.mrf.mxu1 }
 0x35f   :  { %v3424_v25 = vpop.f32.mrf.mxu1 }
 0x360   :  { %v3425_v26 = vadd.f32 %v3424_v25, %v3423_v24 }
 0x361   :  { %v3426_v28 = vpop.f32.mrf.mxu1 }
 0x362   :  { %v2979_v29 = vadd.f32 %v3425_v26, %v2939_v23 }
 0x363   :  { %v3427_v30 = vpop.f32.mrf.mxu1 }
 0x364   :  { %v2991_v31 = vadd.f32 %v3340_v27, %v2979_v29 }
 0x366   :  { %2993 = vst.msk [vmem:[%s4364_s10] sm:$0xff] %vm2992_vm1, %v2991_v31 }
 0x367   :  { %2998 = vsyncpa [#allocation3], 1 }
 0x368   :  { %2999 = vsyncpa [#allocation5], 1 }

</bundles_post_ra>
